<compile_context>
chip_gen: v5e
topology: v5e:2x2
jax: 0.10.0
libtpu: 0.0.40
codegen_flags: <defaults>
</compile_context>

<pallas_src>
import jax
import jax.numpy as jnp
from jax.experimental import pallas as pl
from jax.experimental.pallas import tpu as pltpu

EPS = 1e-5  # nn.BatchNorm1d default eps


# --------------------------------------------------------------------------- #
# Kernel: two fused (Linear + folded-BN) -> ReLU layers on one batch tile.
# --------------------------------------------------------------------------- #
def shared_encoder_kernel(x_ref, w1_ref, b1_ref, w2_ref, b2_ref, out_ref):
    # Layer 1: bf16 matmul on MXU, f32 accumulate -> f32 bias -> ReLU.
    h1 = (
        jnp.dot(x_ref[...], w1_ref[...], preferred_element_type=jnp.float32)
        + b1_ref[...]
    )
    h1 = jnp.maximum(h1, 0.0).astype(jnp.bfloat16)  # Dropout = identity (eval)
    # Layer 2: bf16 matmul, f32 accumulate -> f32 bias -> ReLU.
    y2 = (
        jnp.dot(h1, w2_ref[...], preferred_element_type=jnp.float32)
        + b2_ref[...]
    )
    out_ref[...] = jnp.maximum(y2, 0.0).astype(out_ref.dtype)


# --------------------------------------------------------------------------- #
# Wrapper: BN folding, bf16 cast, conditional lane-dense padding, batch grid.
# --------------------------------------------------------------------------- #
def _round_up(n, m):
    return ((n + m - 1) // m) * m


def _fold_bn(w, b, g, be, m, v):
    """Fold eval-mode BatchNorm1d + Linear bias into (W', b')."""
    scale = g * jax.lax.rsqrt(v + EPS)          # [1, H]
    return w * scale, (b - m) * scale + be      # [in, H], [1, H]


def _maybe_pad2d(a, rows, cols):
    pr, pc = rows - a.shape[0], cols - a.shape[1]
    if pr == 0 and pc == 0:
        return a                                 # zero-copy path
    return jnp.pad(a, ((0, pr), (0, pc)))


def shared_encoder(x, params, *, tile_b=None):
    """Fused 2-layer encoder. x: [B, D_in] float. Returns [B, hidden_dims[-1]] f32."""
    B, d_in = x.shape
    h1 = params["w1"].shape[1]
    h2 = params["w2"].shape[1]

    # Fold BN (+ bias) into the weights once, outside the kernel.
    w1f, b1f = _fold_bn(params["w1"], params["b1"], params["g1"],
                        params["be1"], params["m1"], params["v1"])
    w2f, b2f = _fold_bn(params["w2"], params["b2"], params["g2"],
                        params["be2"], params["m2"], params["v2"])

    # Lane-dense feature padding targets (multiples of 128).
    d_in_p = _round_up(d_in, 128)
    h1_p = _round_up(h1, 128)
    h2_p = _round_up(h2, 128)

    # Batch tile: aim for >=4 grid steps (2 TCs x >=2 steps on v7x), cap at 512.
    if tile_b is None:
        tile_b = max(8, min(512, _round_up(pl.cdiv(B, 4), 8)))
    tile_b = max(8, min(_round_up(tile_b, 8), _round_up(B, 8)))
    b_p = _round_up(B, tile_b)

    # bf16 MXU operands (no-op if already bf16); biases stay f32.
    x_p = _maybe_pad2d(x.astype(jnp.bfloat16), b_p, d_in_p)
    w1_p = _maybe_pad2d(w1f.astype(jnp.bfloat16), d_in_p, h1_p)
    w2_p = _maybe_pad2d(w2f.astype(jnp.bfloat16), h1_p, h2_p)
    b1_p = _maybe_pad2d(b1f, 1, h1_p)
    b2_p = _maybe_pad2d(b2f, 1, h2_p)

    grid = (b_p // tile_b,)

    # VMEM budget: double-buffered x/out tiles + f32 h1 temp + weights (x2 margin).
    weight_bytes = (d_in_p * h1_p + h1_p * h2_p) * 2 + (h1_p + h2_p) * 4
    stream_bytes = 2 * tile_b * d_in_p * 2 + 2 * tile_b * h2_p * 4
    temp_bytes = 2 * tile_b * h1_p * 4
    vmem_limit = int(min(56 << 20,
                         max(16 << 20,
                             2 * weight_bytes + stream_bytes + temp_bytes + (4 << 20))))

    cost = pl.CostEstimate(
        flops=2 * b_p * (d_in_p * h1_p + h1_p * h2_p),
        transcendentals=0,
        bytes_accessed=b_p * d_in_p * 2 + b_p * h2_p * 4 + weight_bytes,
    )

    out_shape = jax.ShapeDtypeStruct((b_p, h2_p), jnp.float32)

    def _run(weight_mode):
        def wspec(shape):
            if weight_mode is None:
                return pl.BlockSpec(shape, lambda i: (0, 0))
            return pl.BlockSpec(shape, lambda i: (0, 0), pipeline_mode=weight_mode)

        in_specs = [
            pl.BlockSpec((tile_b, d_in_p), lambda i: (i, 0)),   # x: tiled over batch
            wspec((d_in_p, h1_p)),                              # W1': resident
            wspec((1, h1_p)),                                   # b1': resident
            wspec((h1_p, h2_p)),                                # W2': resident
            wspec((1, h2_p)),                                   # b2': resident
        ]
        return pl.pallas_call(
            shared_encoder_kernel,
            out_shape=out_shape,
            grid=grid,
            in_specs=in_specs,
            out_specs=pl.BlockSpec((tile_b, h2_p), lambda i: (i, 0)),
            compiler_params=pltpu.CompilerParams(
                dimension_semantics=("parallel",),   # batch tiles shard across TCs
                vmem_limit_bytes=vmem_limit,
            ),
            cost_estimate=cost,
        )(x_p, w1_p, b1_p, w2_p, b2_p)

    try:
        out = _run(pl.Buffered(1))   # single-buffer the constant-index weights
    except Exception:
        out = _run(None)             # fall back to default double-buffering

    # Strip batch / feature padding only when it was added.
    if b_p != B or h2_p != h2:
        out = out[:B, :h2]
    return out


# --------------------------------------------------------------------------- #
# Synthetic params (shapes follow the PyTorch module) + pure-JAX reference.
# --------------------------------------------------------------------------- #
def init_params(key, input_dim, hidden_dims):
    params = {}
    prev = input_dim
    for li, h in enumerate(hidden_dims, start=1):
        key, kw, kb, kg, kbe, km, kv = jax.random.split(key, 7)
        # PyTorch Linear weight is [out, in]; stored transposed as [in, out].
        params[f"w{li}"] = 0.1 * jax.random.normal(kw, (prev, h), jnp.float32)
        params[f"b{li}"] = 0.1 * jax.random.normal(kb, (1, h), jnp.float32)
        params[f"g{li}"] = 1.0 + 0.1 * jax.random.normal(kg, (1, h), jnp.float32)  # BN weight
        params[f"be{li}"] = 0.1 * jax.random.normal(kbe, (1, h), jnp.float32)      # BN bias
        params[f"m{li}"] = 0.1 * jax.random.normal(km, (1, h), jnp.float32)        # running_mean
        params[f"v{li}"] = jax.random.uniform(kv, (1, h), jnp.float32, 0.5, 1.5)   # running_var
        prev = h
    return params


def reference(x, params, hidden_dims):
    h = x
    for li in range(1, len(hidden_dims) + 1):
        y = h @ params[f"w{li}"] + params[f"b{li}"]
        y = (y - params[f"m{li}"]) / jnp.sqrt(params[f"v{li}"] + EPS)
        y = y * params[f"g{li}"] + params[f"be{li}"]
        h = jnp.maximum(y, 0.0)
    return h


if __name__ == "__main__":
    key = jax.random.PRNGKey(0)

    # Test 1: lane-/tile-aligned shapes -> zero-copy (no pad / no slice) path,
    # two grid steps over the batch.
    batch, input_dim, hidden_dims = 256, 128, [256, 128]
    key, kx, kp = jax.random.split(key, 3)
    x = jax.random.normal(kx, (batch, input_dim), jnp.float32)
    params = init_params(kp, input_dim, hidden_dims)
    out = jax.block_until_ready(shared_encoder(x, params, tile_b=128))
    ref = reference(x, params, hidden_dims)
    assert out.shape == (batch, hidden_dims[-1])
    assert jnp.allclose(out, ref, atol=5e-2, rtol=5e-2), "mismatch (aligned case)"

    # Test 2: ragged shapes -> padding + slice path, auto-selected tile_b.
    batch, input_dim, hidden_dims = 200, 96, [160, 72]
    key, kx, kp = jax.random.split(key, 3)
    x = jax.random.normal(kx, (batch, input_dim), jnp.float32)
    params = init_params(kp, input_dim, hidden_dims)
    out = jax.block_until_ready(shared_encoder(x, params))
    ref = reference(x, params, hidden_dims)
    assert out.shape == (batch, hidden_dims[-1])
    assert jnp.allclose(out, ref, atol=5e-2, rtol=5e-2), "mismatch (ragged case)"

    print("KERNEL_OK")
</pallas_src>

<mosaic_0001>
module attributes {stable_mosaic.version = 11 : i64} {
  func.func @shared_encoder_kernel(%arg0: i32, %arg1: memref<128x128xbf16, #tpu.memory_space<vmem>>, %arg2: memref<128x256xbf16, #tpu.memory_space<vmem>>, %arg3: memref<1x256xf32, #tpu.memory_space<vmem>>, %arg4: memref<256x128xbf16, #tpu.memory_space<vmem>>, %arg5: memref<1x128xf32, #tpu.memory_space<vmem>>, %arg6: memref<128x128xf32, #tpu.memory_space<vmem>>) attributes {dimension_semantics = [#tpu.dimension_semantics<parallel>], iteration_bounds = array<i64: 2>, scalar_prefetch = 0 : i64, scratch_operands = 0 : i64, tpu.core_type = #tpu.core_type<tc>, window_params = [{transform_indices = @transform_0, window_bounds = array<i64: 128, 128>}, {pipeline_mode = #tpu.pipeline_mode<synchronous>, transform_indices = @transform_1, window_bounds = array<i64: 128, 256>}, {pipeline_mode = #tpu.pipeline_mode<synchronous>, transform_indices = @transform_2, window_bounds = array<i64: 1, 256>}, {pipeline_mode = #tpu.pipeline_mode<synchronous>, transform_indices = @transform_3, window_bounds = array<i64: 256, 128>}, {pipeline_mode = #tpu.pipeline_mode<synchronous>, transform_indices = @transform_4, window_bounds = array<i64: 1, 128>}, {transform_indices = @transform_5, window_bounds = array<i64: 128, 128>}]} {
    %c0 = arith.constant 0 : index
    %c0_0 = arith.constant 0 : index
    %0 = vector.load %arg1[%c0, %c0_0] : memref<128x128xbf16, #tpu.memory_space<vmem>>, vector<128x128xbf16>
    %c0_1 = arith.constant 0 : index
    %c0_2 = arith.constant 0 : index
    %1 = vector.load %arg2[%c0_1, %c0_2] : memref<128x256xbf16, #tpu.memory_space<vmem>>, vector<128x256xbf16>
    %cst = arith.constant dense<0.000000e+00> : vector<128x256xf32>
    %2 = tpu.matmul %0, %1, %cst {dimension_numbers = #tpu.dot_dimension_numbers<[1], [0], [0], [1], [0, 0, 1, 1], [], []>} : vector<128x128xbf16>, vector<128x256xbf16>, vector<128x256xf32> -> vector<128x256xf32>
    %c0_3 = arith.constant 0 : index
    %c0_4 = arith.constant 0 : index
    %3 = vector.load %arg3[%c0_3, %c0_4] : memref<1x256xf32, #tpu.memory_space<vmem>>, vector<1x256xf32>
    %4 = vector.broadcast %3 : vector<1x256xf32> to vector<128x256xf32>
    %5 = arith.addf %2, %4 : vector<128x256xf32>
    %cst_5 = arith.constant 0.000000e+00 : f32
    %6 = vector.broadcast %cst_5 : f32 to vector<128x256xf32>
    %7 = arith.maximumf %5, %6 : vector<128x256xf32>
    %8 = arith.truncf %7 : vector<128x256xf32> to vector<128x256xbf16>
    %c0_6 = arith.constant 0 : index
    %c0_7 = arith.constant 0 : index
    %9 = vector.load %arg4[%c0_6, %c0_7] : memref<256x128xbf16, #tpu.memory_space<vmem>>, vector<256x128xbf16>
    %cst_8 = arith.constant dense<0.000000e+00> : vector<128x128xf32>
    %10 = tpu.matmul %8, %9, %cst_8 {dimension_numbers = #tpu.dot_dimension_numbers<[1], [0], [0], [1], [0, 0, 1, 1], [], []>} : vector<128x256xbf16>, vector<256x128xbf16>, vector<128x128xf32> -> vector<128x128xf32>
    %c0_9 = arith.constant 0 : index
    %c0_10 = arith.constant 0 : index
    %11 = vector.load %arg5[%c0_9, %c0_10] : memref<1x128xf32, #tpu.memory_space<vmem>>, vector<1x128xf32>
    %12 = vector.broadcast %11 : vector<1x128xf32> to vector<128x128xf32>
    %13 = arith.addf %10, %12 : vector<128x128xf32>
    %cst_11 = arith.constant 0.000000e+00 : f32
    %14 = vector.broadcast %cst_11 : f32 to vector<128x128xf32>
    %15 = arith.maximumf %13, %14 : vector<128x128xf32>
    %c0_12 = arith.constant 0 : index
    %c0_13 = arith.constant 0 : index
    %16 = vector.load %arg6[%c0_12, %c0_13] : memref<128x128xf32, #tpu.memory_space<vmem>>, vector<128x128xf32>
    tpu.vector_store %arg6[%c0_12, %c0_13], %15 {strides = array<i32>} : memref<128x128xf32, #tpu.memory_space<vmem>>, vector<128x128xf32>,
    return
  }
  func.func @transform_0(%arg0: i32) -> (i32, i32) {
    %c0_i32 = arith.constant 0 : i32
    %c0_i32_0 = arith.constant 0 : i32
    return %arg0, %c0_i32 : i32, i32
  }
  func.func @transform_1(%arg0: i32) -> (i32, i32) {
    %c0_i32 = arith.constant 0 : i32
    %c0_i32_0 = arith.constant 0 : i32
    %c0_i32_1 = arith.constant 0 : i32
    return %c0_i32, %c0_i32_0 : i32, i32
  }
  func.func @transform_2(%arg0: i32) -> (i32, i32) {
    %c0_i32 = arith.constant 0 : i32
    %c0_i32_0 = arith.constant 0 : i32
    %c0_i32_1 = arith.constant 0 : i32
    return %c0_i32, %c0_i32_0 : i32, i32
  }
  func.func @transform_3(%arg0: i32) -> (i32, i32) {
    %c0_i32 = arith.constant 0 : i32
    %c0_i32_0 = arith.constant 0 : i32
    %c0_i32_1 = arith.constant 0 : i32
    return %c0_i32, %c0_i32_0 : i32, i32
  }
  func.func @transform_4(%arg0: i32) -> (i32, i32) {
    %c0_i32 = arith.constant 0 : i32
    %c0_i32_0 = arith.constant 0 : i32
    %c0_i32_1 = arith.constant 0 : i32
    return %c0_i32, %c0_i32_0 : i32, i32
  }
  func.func @transform_5(%arg0: i32) -> (i32, i32) {
    %c0_i32 = arith.constant 0 : i32
    %c0_i32_0 = arith.constant 0 : i32
    return %arg0, %c0_i32 : i32, i32
  }
}

module attributes {stable_mosaic.version = 11 : i64} {
  func.func @shared_encoder_kernel(%arg0: i32, %arg1: memref<128x128xbf16, #tpu.memory_space<vmem>>, %arg2: memref<128x256xbf16, #tpu.memory_space<vmem>>, %arg3: memref<1x256xf32, #tpu.memory_space<vmem>>, %arg4: memref<256x128xbf16, #tpu.memory_space<vmem>>, %arg5: memref<1x128xf32, #tpu.memory_space<vmem>>, %arg6: memref<128x128xf32, #tpu.memory_space<vmem>>) attributes {dimension_semantics = [#tpu.dimension_semantics<parallel>], iteration_bounds = array<i64: 2>, scalar_prefetch = 0 : i64, scratch_operands = 0 : i64, tpu.core_type = #tpu.core_type<tc>, window_params = [{transform_indices = @transform_0, window_bounds = array<i64: 128, 128>}, {pipeline_mode = #tpu.pipeline_mode<synchronous>, transform_indices = @transform_1, window_bounds = array<i64: 128, 256>}, {pipeline_mode = #tpu.pipeline_mode<synchronous>, transform_indices = @transform_2, window_bounds = array<i64: 1, 256>}, {pipeline_mode = #tpu.pipeline_mode<synchronous>, transform_indices = @transform_3, window_bounds = array<i64: 256, 128>}, {pipeline_mode = #tpu.pipeline_mode<synchronous>, transform_indices = @transform_4, window_bounds = array<i64: 1, 128>}, {transform_indices = @transform_5, window_bounds = array<i64: 128, 128>}]} {
    %c0 = arith.constant 0 : index
    %c0_0 = arith.constant 0 : index
    %0 = vector.load %arg1[%c0, %c0_0] : memref<128x128xbf16, #tpu.memory_space<vmem>>, vector<128x128xbf16>
    %c0_1 = arith.constant 0 : index
    %c0_2 = arith.constant 0 : index
    %1 = vector.load %arg2[%c0_1, %c0_2] : memref<128x256xbf16, #tpu.memory_space<vmem>>, vector<128x256xbf16>
    %cst = arith.constant dense<0.000000e+00> : vector<128x256xf32>
    %2 = tpu.matmul %0, %1, %cst {dimension_numbers = #tpu.dot_dimension_numbers<[1], [0], [0], [1], [0, 0, 1, 1], [], []>} : vector<128x128xbf16>, vector<128x256xbf16>, vector<128x256xf32> -> vector<128x256xf32>
    %c0_3 = arith.constant 0 : index
    %c0_4 = arith.constant 0 : index
    %3 = vector.load %arg3[%c0_3, %c0_4] : memref<1x256xf32, #tpu.memory_space<vmem>>, vector<1x256xf32>
    %4 = vector.broadcast %3 : vector<1x256xf32> to vector<128x256xf32>
    %5 = arith.addf %2, %4 : vector<128x256xf32>
    %cst_5 = arith.constant 0.000000e+00 : f32
    %6 = vector.broadcast %cst_5 : f32 to vector<128x256xf32>
    %7 = arith.maximumf %5, %6 : vector<128x256xf32>
    %8 = arith.truncf %7 : vector<128x256xf32> to vector<128x256xbf16>
    %c0_6 = arith.constant 0 : index
    %c0_7 = arith.constant 0 : index
    %9 = vector.load %arg4[%c0_6, %c0_7] : memref<256x128xbf16, #tpu.memory_space<vmem>>, vector<256x128xbf16>
    %cst_8 = arith.constant dense<0.000000e+00> : vector<128x128xf32>
    %10 = tpu.matmul %8, %9, %cst_8 {dimension_numbers = #tpu.dot_dimension_numbers<[1], [0], [0], [1], [0, 0, 1, 1], [], []>} : vector<128x256xbf16>, vector<256x128xbf16>, vector<128x128xf32> -> vector<128x128xf32>
    %c0_9 = arith.constant 0 : index
    %c0_10 = arith.constant 0 : index
    %11 = vector.load %arg5[%c0_9, %c0_10] : memref<1x128xf32, #tpu.memory_space<vmem>>, vector<1x128xf32>
    %12 = vector.broadcast %11 : vector<1x128xf32> to vector<128x128xf32>
    %13 = arith.addf %10, %12 : vector<128x128xf32>
    %cst_11 = arith.constant 0.000000e+00 : f32
    %14 = vector.broadcast %cst_11 : f32 to vector<128x128xf32>
    %15 = arith.maximumf %13, %14 : vector<128x128xf32>
    %c0_12 = arith.constant 0 : index
    %c0_13 = arith.constant 0 : index
    %16 = vector.load %arg6[%c0_12, %c0_13] : memref<128x128xf32, #tpu.memory_space<vmem>>, vector<128x128xf32>
    tpu.vector_store %arg6[%c0_12, %c0_13], %15 {strides = array<i32>} : memref<128x128xf32, #tpu.memory_space<vmem>>, vector<128x128xf32>,
    return
  }
  func.func @transform_0(%arg0: i32) -> (i32, i32) {
    %c0_i32 = arith.constant 0 : i32
    %c0_i32_0 = arith.constant 0 : i32
    return %arg0, %c0_i32 : i32, i32
  }
  func.func @transform_1(%arg0: i32) -> (i32, i32) {
    %c0_i32 = arith.constant 0 : i32
    %c0_i32_0 = arith.constant 0 : i32
    %c0_i32_1 = arith.constant 0 : i32
    return %c0_i32, %c0_i32_0 : i32, i32
  }
  func.func @transform_2(%arg0: i32) -> (i32, i32) {
    %c0_i32 = arith.constant 0 : i32
    %c0_i32_0 = arith.constant 0 : i32
    %c0_i32_1 = arith.constant 0 : i32
    return %c0_i32, %c0_i32_0 : i32, i32
  }
  func.func @transform_3(%arg0: i32) -> (i32, i32) {
    %c0_i32 = arith.constant 0 : i32
    %c0_i32_0 = arith.constant 0 : i32
    %c0_i32_1 = arith.constant 0 : i32
    return %c0_i32, %c0_i32_0 : i32, i32
  }
  func.func @transform_4(%arg0: i32) -> (i32, i32) {
    %c0_i32 = arith.constant 0 : i32
    %c0_i32_0 = arith.constant 0 : i32
    %c0_i32_1 = arith.constant 0 : i32
    return %c0_i32, %c0_i32_0 : i32, i32
  }
  func.func @transform_5(%arg0: i32) -> (i32, i32) {
    %c0_i32 = arith.constant 0 : i32
    %c0_i32_0 = arith.constant 0 : i32
    return %arg0, %c0_i32 : i32, i32
  }
}

</mosaic_0001>

<bundles_post_ra>
// kernel: tpu_custom_call.1
= control target key start
LH: loop header
LB: loop body
LE: loop exit
PB: predicated region body
PF: predicated region fallthrough
CT: control target
= control target key end

     0   :  { %10 = vsyncpa [#allocation3], 0  ;;  %s1779_s0 = inlined_call_operand.hbm [shape: bf16[256,128], index: 0, kind: input, shape index: {}]   ;;  %s1780_s1 = inlined_call_operand.hbm [shape: bf16[128,256], index: 1, kind: input, shape index: {}]   ;;  %s1781_s2 = inlined_call_operand.hbm [shape: f32[1,256], index: 2, kind: input, shape index: {}]   ;;  %s1782_s3 = inlined_call_operand.hbm [shape: bf16[256,128], index: 3, kind: input, shape index: {}]   ;;  %s1783_s4 = inlined_call_operand.vmem [shape: f32[1,128], index: 4, kind: input, shape index: {}]   ;;  %s1784_s5 = inlined_call_operand.hbm [shape: f32[256,128], index: 5, kind: output, shape index: {}]  }
   0x1   :  { %12 = vsyncpa [#allocation3 + $0x1], 0 }
   0x2   :  { %13 = vsyncpa [#allocation6], 0 }
   0x3   :  { %14 = vsyncpa [#allocation9], 0 }
   0x4   :  { %15 = vsyncpa [#allocation4], 0 }
   0x5   :  { %17 = vsyncpa [#allocation4 + $0x1], 0  ;;  %s1528_s18 = smov 0   ;;  %s1530_s19 = smov 0  }
   0x6   :  { %s1532_s20 = smov 0   ;;  %s1534_s21 = smov 0  }
   0x7 LB: > { %s1549_s22 = sadd.s32 4294967295, %s1487_s21   ;;  %s987_s23 = sadd.s32 4294967294, %s1487_s21   ;;  %s1487_s21 = sphi %s1534_s21, %s1797_s21   ;;  %s1483_s20 = sphi %s1532_s20, %s1796_s20   ;;  %s1479_s19 = sphi %s1530_s19, %s1795_s19   ;;  %s1475_s18 = sphi %s1528_s18, %s1794_s18  }
   0x8   : > { %p43_p0 = scmp.ne.s32.totalorder %s1479_s19, %s1475_s18  ;;  %p44_p1 = scmp.eq.s32.totalorder %s1549_s22, 0 }
   0x9   : > { %p151_p2 = scmp.eq.s32.totalorder %s1549_s22, 1  ;;  %p157_p3 = scmp.eq.s32.totalorder %s987_s23, 1 }
   0xa   : > { %p1558_p4 = por %p44_p1, %p43_p0  ;;  %p988_p5 = scmp.ge.s32.totalorder %s1487_s21, 1 }
   0xb   : > { %p1563_p6 = por %p157_p3, %p43_p0  ;;  %p164_p7 = scmp.lt.s32.totalorder %s1487_s21, 3 }
   0xc   : > { %s175_s28 = sshll.u32 %s1780_s1, 4  ;;  %s1489_s30 = smov [#allocation5]   ;;  %s176_s28 = int_to_ptr.hbm [resolvable:$true] %s175_s28 }
   0xd   : > { %p1571_p8 = pnand %p988_p5, %p164_p7  ;;  %s177_s6 = sshll.u32 %s1489_s30, 4  ;;  %s178_s6 = int_to_ptr.vmem [resolvable:$true] %s177_s6 }
   0xe   : > { %s190_s10 = sshll.u32 %s1781_s2, 4  ;;  %s1490_s11 = smov 128   ;;  %s191_s10 = int_to_ptr.hbm [resolvable:$true] %s190_s10 }
   0xf   : > { %p1225_p9 = pneg %p1571_p8  ;;  %s1491_s12 = smov 8  }
  0x10   : > { %s1492_s13 = smov [#allocation7]   ;;  %s201_s17 = sshll.u32 %s1782_s3, 4  ;;  %s202_s17 = int_to_ptr.hbm [resolvable:$true] %s201_s17 }
  0x11   : > { %p1579_p10 = pnand %p1225_p9, %p44_p1  ;;  %s192_s14 = sshll.u32 %s1492_s13, 4  ;;  %s193_s14 = int_to_ptr.vmem [resolvable:$true] %s192_s14 }
  0x12   : > { %s1493_s23 = smov [#allocation8]   ;;  %s1785_s27 = smov 64  }
  0x13   : > { %1228 = dma.hbm_to_vmem [thread:$0]  (!%p1579_p10), %s176_s28, 2048, %s178_s6, [#allocation6], %s1490_s11, %s1490_s11, %s1491_s12  }
  0x14   : > { %1231 = dma.hbm_to_vmem [thread:$0]  (!%p1579_p10), %s191_s10, 32, %s193_s14, [#allocation6]  }
  0x15   : > { %s203_s26 = sshll.u32 %s1493_s23, 4  ;;  %s1495_s28 = smov 4   ;;  %s204_s26 = int_to_ptr.vmem [resolvable:$true] %s203_s26 }
  0x16   : > { %1234 = dma.hbm_to_vmem [thread:$0]  (!%p1579_p10), %s202_s17, 2048, %s204_s26, [#allocation9], %s1785_s27, %s1785_s27, %s1495_s28  }
  0x17   : > { %s1600_s30 = sadd.s32 1, %s1487_s21   ;;  %s30_s8 = sadd.s32 1, %s1483_s20 }
  0x18   : > { %s27_s6 = ssub.s32 %s1487_s21, %s1600_s30  ;;  %p37_p13 = scmp.ne.s32.totalorder %s1483_s20, %s1479_s19 }
  0x19   : > { %p28_p12 = scmp.eq.s32.totalorder %s27_s6, 0  ;;  %p38_p0 = scmp.eq.s32.totalorder %s1487_s21, 0 }
  0x1a   : > { %p1613_p3 = por %p151_p2, %p37_p13  ;;  %p1246_p5 = scmp.lt.s32.totalorder %s1487_s21, 2 }
  0x1b   : > { %s1609_s9 = scalar_select %p28_p12, %s1483_s20, %s30_s8  }
  0x1c   : > { %s220_s7 = sand.u32 1, %s1483_s20   ;;  %s1167_s11 = sshll.u32 %s1487_s21, 6 }
  0x1d   : > { %p39_p7 = por %p38_p0, %p37_p13  ;;  %s993_s12 = sshll.u32 %s220_s7, 6 }
  0x1e   : > { %s229_s15 = scalar_lea.hbm %s1779_s0, %s1167_s11  ;;  %s224_s17 = scalar_lea.vmem [#allocation2], %s993_s12 }
  0x1f   : > { %s230_s16 = sshll.u32 %s229_s15, 4  ;;  %s232_s23 = sshll.u32 %s224_s17, 4  ;;  %s231_s16 = int_to_ptr.hbm [resolvable:$true] %s230_s16  ;;  %s233_s23 = int_to_ptr.vmem [resolvable:$true] %s232_s23 }
  0x20   : > { %p1623_p9 = pnand %p1246_p5, %p39_p7  ;;  %s221_s6 = scalar_lea.sflag [#allocation3], %s220_s7 }
  0x21   : > { %s1383_s8 = sshra.s32 %s231_s16, 4  ;;  %s1390_s12 = scalar_lea.hbm %s1779_s0, 128  ;;  %s1384_s8 = int_to_ptr.hbm [resolvable:$true] %s1383_s8 }
  0x22   : > { %s1385_s27 = scalar_lea.hbm %s1384_s8, 64  ;;  %p1387_p10 = pneg %p1623_p9 }
  0x23   : > { %p1386_p2 = scmp.ne.s32.totalorder %s1384_s8, %s1385_s27  ;;  %p1391_p0 = scmp.lt.s32.totalorder %s1384_s8, %s1779_s0 }
  0x24   : > { %p1392_p5 = scmp.lt.s32.totalorder %s1390_s12, %s1385_s27 }
  0x25   : > { %p1388_p12 = pnand %p1387_p10, %p1386_p2 }
  0x26   : > { %p1393_p7 = por %p1392_p5, %p1391_p0 }
  0x27   : > { %p1389_p13 = pneg %p1388_p12 }
  0x29   : > { %p1394_p11 = pnand %p1393_p7, %p1389_p13 }
  0x2b   : > { %1397 = shalt.err (!%p1394_p11)
}
  0x2c   : > { %s1792_s7 = smov 64   ;;  %244 = sbr.rel (%p1571_p8) target bundleno = 490 (0x1ea), region = 40 }
  0x2d   : > { %1238 = dma.hbm_to_vmem [thread:$0]  (!%p1623_p9), %s231_s16, 1024, %s233_s23, %s221_s6, %s1792_s7, %s1792_s7, %s1495_s28  }
  0x2e   : > { %s1643_s17 = sand.u32 (!%p1571_p8), 1, %s1479_s19  }
  0x2f   : > { %s997_s8 = sshll.u32 (!%p1571_p8), %s1643_s17, 6  ;;  %s247_s27 = scalar_lea.sflag (!%p1571_p8), [#allocation3], %s1643_s17 }
  0x30   : > { %s1647_s11 = scalar_lea.vmem (!%p1571_p8), [#allocation2], %s997_s8 }
  0x31   : > { %1458 = dma.done.wait (%p1558_p4), %s247_s27, 1024  }
  0x32   : > { %1460 = vsyncadd (%p1558_p4), %s247_s27, 4294966272 }
  0x33   : > { %1462 = dma.done.wait (%p44_p1), [#allocation6], 2080  }
  0x34   : > { %1464 = vsyncadd (%p44_p1), [#allocation6], 4294965216 }
  0x35   : > { %1466 = dma.done.wait (%p44_p1), [#allocation9], 2048  }
  0x36   : > { %1468 = vsyncadd (%p44_p1), [#allocation9], 4294965248  ;;  %v1092_v0 = vld [vmem:[#allocation5 + $0x70] sm:$0xf]  ;;  %v1191_v1 = vld [vmem:[#allocation5 + $0x74] sm:$0xf0] }
  0x37   : > { %v1190_v2 = vld [vmem:[#allocation5 + $0x74] sm:$0xf]  ;;  %v1093_v3 = vor.u32 %v1191_v1, %v1092_v0  ;;  %v1094_v4 = vld [vmem:[#allocation5 + $0x78] sm:$0xf0]  ;;  %v1084_v5 = vld [vmem:[#allocation5 + $0x60] sm:$0xf] }
  0x38   : > { %v1189_v6 = vld [vmem:[#allocation5 + $0x64] sm:$0xf0]  ;;  %v1097_v7 = vor.u32 %v1190_v2, %v1094_v4  ;;  %v1188_v8 = vld [vmem:[#allocation5 + $0x64] sm:$0xf]  ;;  %v1086_v9 = vld [vmem:[#allocation5 + $0x68] sm:$0xf0] }
  0x39   : > { %461 = vmatpush.bf16.msra.mxu0 %v1093_v3  ;;  %v1085_v10 = vor.u32 %v1189_v6, %v1084_v5  ;;  %v1089_v11 = vor.u32 %v1188_v8, %v1086_v9  ;;  %v1076_v12 = vld [vmem:[#allocation5 + $0x50] sm:$0xf]  ;;  %v1187_v13 = vld [vmem:[#allocation5 + $0x54] sm:$0xf0]  ;;  %v1186_v14 = vld [vmem:[#allocation5 + $0x54] sm:$0xf] }
  0x3a   : > { %510 = vmatpush.bf16.msra.mxu1 %v1097_v7  ;;  %v1078_v15 = vld [vmem:[#allocation5 + $0x58] sm:$0xf0]  ;;  %v1077_v16 = vor.u32 %v1187_v13, %v1076_v12  ;;  %v1068_v18 = vld [vmem:[#allocation5 + $0x40] sm:$0xf]  ;;  %v1185_v19 = vld [vmem:[#allocation5 + $0x44] sm:$0xf0] }
  0x3b   : > { %v1081_v17 = vor.u32 %v1186_v14, %v1078_v15  ;;  %v1184_v20 = vld [vmem:[#allocation5 + $0x44] sm:$0xf]  ;;  %v1070_v21 = vld [vmem:[#allocation5 + $0x48] sm:$0xf0]  ;;  %v1069_v22 = vor.u32 %v1185_v19, %v1068_v18  ;;  %v1060_v24 = vld [vmem:[#allocation5 + $0x30] sm:$0xf] }
  0x3c   : > { %v1073_v23 = vor.u32 %v1184_v20, %v1070_v21  ;;  %v1183_v25 = vld [vmem:[#allocation5 + $0x34] sm:$0xf0]  ;;  %v1182_v26 = vld [vmem:[#allocation5 + $0x34] sm:$0xf]  ;;  %v1062_v27 = vld [vmem:[#allocation5 + $0x38] sm:$0xf0] }
  0x3d   : > { %462 = vmatpush.bf16.msra.mxu0 %v1085_v10  ;;  %v1061_v28 = vor.u32 %v1183_v25, %v1060_v24  ;;  %v1065_v29 = vor.u32 %v1182_v26, %v1062_v27  ;;  %v1052_v30 = vld [vmem:[#allocation5 + $0x20] sm:$0xf]  ;;  %v1181_v31 = vld [vmem:[#allocation5 + $0x24] sm:$0xf0]  ;;  %v1180_v32 = vld [vmem:[#allocation5 + $0x24] sm:$0xf] }
  0x3e   : > { %511 = vmatpush.bf16.msra.mxu1 %v1089_v11  ;;  %v1054_v33 = vld [vmem:[#allocation5 + $0x28] sm:$0xf0]  ;;  %v1053_v34 = vor.u32 %v1181_v31, %v1052_v30  ;;  %v1044_v36 = vld [vmem:[#allocation5 + $0x10] sm:$0xf]  ;;  %v1179_v37 = vld [vmem:[#allocation5 + $0x14] sm:$0xf0] }
  0x3f   : > { %v1057_v35 = vor.u32 %v1180_v32, %v1054_v33  ;;  %v1178_v38 = vld [vmem:[#allocation5 + $0x14] sm:$0xf]  ;;  %v1046_v39 = vld [vmem:[#allocation5 + $0x18] sm:$0xf0]  ;;  %v1045_v40 = vor.u32 %v1179_v37, %v1044_v36  ;;  %v1036_v42 = vld [vmem:[#allocation5] sm:$0xf] }
  0x40   : > { %v1049_v41 = vor.u32 %v1178_v38, %v1046_v39  ;;  %v1177_v43 = vld [vmem:[#allocation5 + $0x4] sm:$0xf0]  ;;  %v1176_v44 = vld [vmem:[#allocation5 + $0x4] sm:$0xf]  ;;  %v1038_v45 = vld [vmem:[#allocation5 + $0x8] sm:$0xf0] }
  0x41   : > { %463 = vmatpush.bf16.msra.mxu0 %v1077_v16  ;;  %v1037_v46 = vor.u32 %v1177_v43, %v1036_v42  ;;  %v1041_v47 = vor.u32 %v1176_v44, %v1038_v45  ;;  %v1168_v48 = vld [vmem:[%s1647_s11] sm:$0xff]  ;;  %v1169_v49 = vld [vmem:[%s1647_s11 + $0x8] sm:$0xff]  ;;  %v1170_v50 = vld [vmem:[%s1647_s11 + $0x10] sm:$0xff]  ;;  %s1001_s28 = sshll.u32 %s1643_s17, 7  ;;  %s1208_s23 = sshll.u32 %s1549_s22, 7 }
  0x42   : > { %512 = vmatpush.bf16.msra.mxu1 %v1081_v17  ;;  %v1171_v51 = vld [vmem:[%s1647_s11 + $0x18] sm:$0xff]  ;;  %v1172_v52 = vld [vmem:[%s1647_s11 + $0x20] sm:$0xff]  ;;  %v1173_v55 = vld [vmem:[%s1647_s11 + $0x28] sm:$0xff]  ;;  %s1712_s16 = scalar_lea.vmem [#allocation10], %s1001_s28  ;;  %s881_s13 = scalar_lea.hbm %s1784_s5, %s1208_s23 }
  0x43   : > { %v1199_v53 = vld [vmem:[#allocation8 + $0x38] sm:$0xff]  ;;  %v1198_v56 = vld [vmem:[#allocation8 + $0x30] sm:$0xff]  ;;  %v1197_v58 = vld [vmem:[#allocation8 + $0x28] sm:$0xff]  ;;  %s882_s12 = sshll.u32 %s1712_s16, 4  ;;  %s884_s14 = sshll.u32 %s881_s13, 4  ;;  %s883_s12 = int_to_ptr.vmem [resolvable:$true] %s882_s12  ;;  %s885_s14 = int_to_ptr.hbm [resolvable:$true] %s884_s14 }
  0x44   : > { %v1207_v54 = vld [vmem:[#allocation8 + $0x78] sm:$0xff]  ;;  %739 = vmatpush.bf16.msra.mxu2 %v1199_v53  ;;  %v1206_v57 = vld [vmem:[#allocation8 + $0x70] sm:$0xff]  ;;  %v1205_v59 = vld [vmem:[#allocation8 + $0x68] sm:$0xff]  ;;  %s870_s15 = scalar_lea.sflag [#allocation4], %s1643_s17  ;;  %s1427_s22 = sshra.s32 %s885_s14, 4  ;;  %s1428_s22 = int_to_ptr.hbm [resolvable:$true] %s1427_s22 }
  0x45   : > { %464 = vmatpush.bf16.msra.mxu0 %v1069_v22  ;;  %788 = vmatpush.bf16.msra.mxu3 %v1207_v54  ;;  %v1196_v60 = vld [vmem:[#allocation8 + $0x20] sm:$0xff]  ;;  %v1174_v62 = vld [vmem:[%s1647_s11 + $0x30] sm:$0xff]  ;;  %v1195_v63 = vld [vmem:[#allocation8 + $0x18] sm:$0xff]  ;;  %s1429_s7 = scalar_lea.hbm %s1428_s22, 128  ;;  %p1434_p11 = scmp.lt.s32.totalorder %s1428_s22, %s1784_s5 }
  0x46   : > { %513 = vmatpush.bf16.msra.mxu1 %v1073_v23  ;;  %v1204_v61 = vld [vmem:[#allocation8 + $0x60] sm:$0xff]  ;;  %v1203_v0 = vld [vmem:[#allocation8 + $0x58] sm:$0xff]  ;;  %v1194_v1 = vld [vmem:[#allocation8 + $0x10] sm:$0xff]  ;;  %p1430_p1 = scmp.ne.s32.totalorder %s1428_s22, %s1429_s7 }
  0x47   : > { %v1202_v2 = vld [vmem:[#allocation8 + $0x50] sm:$0xff]  ;;  %v1193_v3 = vld [vmem:[#allocation8 + $0x8] sm:$0xff]  ;;  %v1192_v5 = vld [vmem:[#allocation8] sm:$0xff] }
  0x48   : > { %740 = vmatpush.bf16.msra.mxu2 %v1198_v56  ;;  %v1201_v4 = vld [vmem:[#allocation8 + $0x48] sm:$0xff]  ;;  %v1200_v6 = vld [vmem:[#allocation8 + $0x40] sm:$0xff]  ;;  %v1175_v7 = vld [vmem:[%s1647_s11 + $0x38] sm:$0xff]  ;;  %p1431_p4 = pnand %p1430_p1, %p1613_p3  ;;  %s1433_s11 = scalar_lea.hbm %s1784_s5, 256 }
  0x49   : > { %465 = vmatpush.bf16.msra.mxu0 %v1061_v28  ;;  %789 = vmatpush.bf16.msra.mxu3 %v1206_v57  ;;  %v327_v8 = vld [vmem:[#allocation7] sm:$0x3]  ;;  %p1435_p9 = scmp.lt.s32.totalorder %s1433_s11, %s1429_s7 }
  0x4a   : > { %514 = vmatpush.bf16.msra.mxu1 %v1065_v29  ;;  %v1669_v11 = vperm.slane %v327_v8, 0  ;;  %v1671_v12 = vperm.slane %v327_v8, 1  ;;  %p1432_p8 = pneg %p1431_p4 }
  0x4b   : > { %p1436_p2 = por %p1435_p9, %p1434_p11 }
  0x4c   : > { %741 = vmatpush.bf16.msra.mxu2 %v1197_v58 }
  0x4d   : > { %466 = vmatpush.bf16.msra.mxu0 %v1053_v34  ;;  %790 = vmatpush.bf16.msra.mxu3 %v1205_v59  ;;  %p1437_p10 = pnand %p1436_p2, %p1432_p8 }
  0x4e   : > { %515 = vmatpush.bf16.msra.mxu1 %v1057_v35 }
  0x50   : > { %742 = vmatpush.bf16.msra.mxu2 %v1196_v60 }
  0x51   : > { %467 = vmatpush.bf16.msra.mxu0 %v1045_v40  ;;  %791 = vmatpush.bf16.msra.mxu3 %v1204_v61 }
  0x52   : > { %516 = vmatpush.bf16.msra.mxu1 %v1049_v41 }
  0x54   : > { %743 = vmatpush.bf16.msra.mxu2 %v1195_v63 }
  0x55   : > { %468 = vmatpush.bf16.msra.mxu0 %v1037_v46  ;;  %792 = vmatpush.bf16.msra.mxu3 %v1203_v0 }
  0x56   : > { %517 = vmatpush.bf16.msra.mxu1 %v1041_v47 }
  0x58   : > { %469 = vmatmul.bf16.vlgmr.msra.gmra.mxu0 %v1168_v48  ;;  %744 = vmatpush.bf16.msra.mxu2 %v1194_v1 }
  0x59   : > { %518 = vmatmul.bf16.vlgmr.msra.gmra.mxu1 %v1168_v48  ;;  %793 = vmatpush.bf16.msra.mxu3 %v1202_v2 }
  0x5c   : > { %745 = vmatpush.bf16.msra.mxu2 %v1193_v3 }
  0x5d   : > { %794 = vmatpush.bf16.msra.mxu3 %v1201_v4 }
  0x60   : > { %746 = vmatpush.bf16.msra.mxu2 %v1192_v5 }
  0x61   : > { %795 = vmatpush.bf16.msra.mxu3 %v1200_v6 }
  0x68   : > { %474 = vmatmul.bf16.gmra.mxu0 %v1169_v49 }
  0x69   : > { %523 = vmatmul.bf16.gmra.mxu1 %v1169_v49 }
  0x78   : > { %479 = vmatmul.bf16.gmra.mxu0 %v1170_v50 }
  0x79   : > { %528 = vmatmul.bf16.gmra.mxu1 %v1170_v50 }
  0x88   : > { %484 = vmatmul.bf16.gmra.mxu0 %v1171_v51 }
  0x89   : > { %533 = vmatmul.bf16.gmra.mxu1 %v1171_v51 }
  0x98   : > { %489 = vmatmul.bf16.gmra.mxu0 %v1172_v52 }
  0x99   : > { %538 = vmatmul.bf16.gmra.mxu1 %v1172_v52 }
  0xa8   : > { %494 = vmatmul.bf16.gmra.mxu0 %v1173_v55 }
  0xa9   : > { %543 = vmatmul.bf16.gmra.mxu1 %v1173_v55 }
  0xb8   : > { %499 = vmatmul.bf16.gmra.mxu0 %v1174_v62 }
  0xb9   : > { %548 = vmatmul.bf16.gmra.mxu1 %v1174_v62 }
  0xc8   : > { %504 = vmatmul.bf16.gmra.mxu0 %v1175_v7 }
  0xc9   : > { %553 = vmatmul.bf16.gmra.mxu1 %v1175_v7 }
  0xd5   : > { %v470_v9 = vpop.f32.mrf.mxu0 }
  0xd6   : > { %v519_v10 = vpop.f32.mrf.mxu1  ;;  %v471_v13 = vadd.f32 %v470_v9, %v1669_v11 }
  0xd7   : > { %v520_v14 = vadd.f32 %v519_v10, %v1671_v12 }
  0xd8   : > { %v559_v19 = vmax.f32 %v471_v13, 0.0 }
  0xd9   : > { %v560_v21 = vmax.f32 %v520_v14, 0.0 }
  0xdd   : > { %v472_v15 = vpop.f32.mrf.mxu0 }
  0xde   : > { %v473_v16 = vadd.f32 %v472_v15, %v1669_v11  ;;  %v521_v17 = vpop.f32.mrf.mxu1 }
  0xdf   : > { %v522_v18 = vadd.f32 %v521_v17, %v1671_v12 }
  0xe0   : > { %v561_v20 = vmax.f32 %v473_v16, 0.0 }
  0xe1   : > { %v562_v22 = vmax.f32 %v522_v18, 0.0 }
  0xe2   : > { %v591_v23 = vpack.c.bf16 %v561_v20, %v559_v19 }
  0xe3   : > { %v592_v24 = vpack.c.bf16 %v562_v22, %v560_v21 }
  0xe4   : > { %747 = vmatmul.bf16.vlgmr.msra.gmra.mxu2 %v591_v23 }
  0xe5   : > { %796 = vmatmul.bf16.vlgmr.msra.gmra.mxu3 %v592_v24  ;;  %v475_v25 = vpop.f32.mrf.mxu0 }
  0xe6   : > { %v524_v26 = vpop.f32.mrf.mxu1  ;;  %v476_v27 = vadd.f32 %v475_v25, %v1669_v11 }
  0xe7   : > { %v525_v28 = vadd.f32 %v524_v26, %v1671_v12 }
  0xe8   : > { %v563_v33 = vmax.f32 %v476_v27, 0.0 }
  0xe9   : > { %v564_v35 = vmax.f32 %v525_v28, 0.0 }
  0xed   : > { %v477_v29 = vpop.f32.mrf.mxu0 }
  0xee   : > { %v478_v30 = vadd.f32 %v477_v29, %v1669_v11  ;;  %v526_v31 = vpop.f32.mrf.mxu1 }
  0xef   : > { %v527_v32 = vadd.f32 %v526_v31, %v1671_v12 }
  0xf0   : > { %v565_v34 = vmax.f32 %v478_v30, 0.0 }
  0xf1   : > { %v566_v36 = vmax.f32 %v527_v32, 0.0 }
  0xf2   : > { %v593_v37 = vpack.c.bf16 %v565_v34, %v563_v33 }
  0xf3   : > { %v594_v38 = vpack.c.bf16 %v566_v36, %v564_v35 }
  0xf4   : > { %752 = vmatmul.bf16.gmra.mxu2 %v593_v37 }
  0xf5   : > { %801 = vmatmul.bf16.gmra.mxu3 %v594_v38  ;;  %v480_v39 = vpop.f32.mrf.mxu0 }
  0xf6   : > { %v529_v40 = vpop.f32.mrf.mxu1  ;;  %v481_v41 = vadd.f32 %v480_v39, %v1669_v11 }
  0xf7   : > { %v530_v42 = vadd.f32 %v529_v40, %v1671_v12 }
  0xf8   : > { %v567_v47 = vmax.f32 %v481_v41, 0.0 }
  0xf9   : > { %v568_v49 = vmax.f32 %v530_v42, 0.0 }
  0xfd   : > { %v482_v43 = vpop.f32.mrf.mxu0 }
  0xfe   : > { %v483_v44 = vadd.f32 %v482_v43, %v1669_v11  ;;  %v531_v45 = vpop.f32.mrf.mxu1 }
  0xff   : > { %v532_v46 = vadd.f32 %v531_v45, %v1671_v12 }
 0x100   : > { %v569_v48 = vmax.f32 %v483_v44, 0.0 }
 0x101   : > { %v570_v50 = vmax.f32 %v532_v46, 0.0 }
 0x102   : > { %v595_v51 = vpack.c.bf16 %v569_v48, %v567_v47 }
 0x103   : > { %v596_v52 = vpack.c.bf16 %v570_v50, %v568_v49 }
 0x104   : > { %757 = vmatmul.bf16.gmra.mxu2 %v595_v51 }
 0x105   : > { %806 = vmatmul.bf16.gmra.mxu3 %v596_v52  ;;  %v485_v53 = vpop.f32.mrf.mxu0 }
 0x106   : > { %v534_v54 = vpop.f32.mrf.mxu1  ;;  %v486_v55 = vadd.f32 %v485_v53, %v1669_v11 }
 0x107   : > { %v535_v56 = vadd.f32 %v534_v54, %v1671_v12 }
 0x108   : > { %v571_v61 = vmax.f32 %v486_v55, 0.0 }
 0x109   : > { %v572_v63 = vmax.f32 %v535_v56, 0.0 }
 0x10d   : > { %v487_v57 = vpop.f32.mrf.mxu0 }
 0x10e   : > { %v488_v58 = vadd.f32 %v487_v57, %v1669_v11  ;;  %v536_v59 = vpop.f32.mrf.mxu1 }
 0x10f   : > { %v537_v60 = vadd.f32 %v536_v59, %v1671_v12 }
 0x110   : > { %v573_v62 = vmax.f32 %v488_v58, 0.0 }
 0x111   : > { %v574_v0 = vmax.f32 %v537_v60, 0.0 }
 0x112   : > { %v597_v1 = vpack.c.bf16 %v573_v62, %v571_v61  ;;  %v1708_v61 = vld [vmem:[%s1783_s4] ss:$0 sm:$0xff] }
 0x113   : > { %v598_v2 = vpack.c.bf16 %v574_v0, %v572_v63 }
 0x114   : > { %762 = vmatmul.bf16.gmra.mxu2 %v597_v1 }
 0x115   : > { %811 = vmatmul.bf16.gmra.mxu3 %v598_v2  ;;  %v490_v3 = vpop.f32.mrf.mxu0 }
 0x116   : > { %v539_v4 = vpop.f32.mrf.mxu1  ;;  %v491_v5 = vadd.f32 %v490_v3, %v1669_v11 }
 0x117   : > { %v540_v6 = vadd.f32 %v539_v4, %v1671_v12 }
 0x118   : > { %v575_v13 = vmax.f32 %v491_v5, 0.0 }
 0x119   : > { %v576_v15 = vmax.f32 %v540_v6, 0.0 }
 0x11d   : > { %v492_v7 = vpop.f32.mrf.mxu0 }
 0x11e   : > { %v493_v8 = vadd.f32 %v492_v7, %v1669_v11  ;;  %v541_v9 = vpop.f32.mrf.mxu1 }
 0x11f   : > { %v542_v10 = vadd.f32 %v541_v9, %v1671_v12 }
 0x120   : > { %v577_v14 = vmax.f32 %v493_v8, 0.0 }
 0x121   : > { %v578_v16 = vmax.f32 %v542_v10, 0.0 }
 0x122   : > { %v599_v17 = vpack.c.bf16 %v577_v14, %v575_v13 }
 0x123   : > { %v600_v18 = vpack.c.bf16 %v578_v16, %v576_v15 }
 0x124   : > { %767 = vmatmul.bf16.gmra.mxu2 %v599_v17 }
 0x125   : > { %816 = vmatmul.bf16.gmra.mxu3 %v600_v18  ;;  %v495_v19 = vpop.f32.mrf.mxu0 }
 0x126   : > { %v544_v20 = vpop.f32.mrf.mxu1  ;;  %v496_v21 = vadd.f32 %v495_v19, %v1669_v11 }
 0x127   : > { %v545_v22 = vadd.f32 %v544_v20, %v1671_v12 }
 0x128   : > { %v579_v27 = vmax.f32 %v496_v21, 0.0 }
 0x129   : > { %v580_v29 = vmax.f32 %v545_v22, 0.0 }
 0x12d   : > { %v497_v23 = vpop.f32.mrf.mxu0 }
 0x12e   : > { %v498_v24 = vadd.f32 %v497_v23, %v1669_v11  ;;  %v546_v25 = vpop.f32.mrf.mxu1 }
 0x12f   : > { %v547_v26 = vadd.f32 %v546_v25, %v1671_v12 }
 0x130   : > { %v581_v28 = vmax.f32 %v498_v24, 0.0 }
 0x131   : > { %v582_v30 = vmax.f32 %v547_v26, 0.0 }
 0x132   : > { %v601_v31 = vpack.c.bf16 %v581_v28, %v579_v27 }
 0x133   : > { %v602_v32 = vpack.c.bf16 %v582_v30, %v580_v29 }
 0x134   : > { %772 = vmatmul.bf16.gmra.mxu2 %v601_v31 }
 0x135   : > { %821 = vmatmul.bf16.gmra.mxu3 %v602_v32  ;;  %v500_v33 = vpop.f32.mrf.mxu0 }
 0x136   : > { %v549_v34 = vpop.f32.mrf.mxu1  ;;  %v501_v35 = vadd.f32 %v500_v33, %v1669_v11 }
 0x137   : > { %v550_v36 = vadd.f32 %v549_v34, %v1671_v12 }
 0x138   : > { %v583_v41 = vmax.f32 %v501_v35, 0.0 }
 0x139   : > { %v584_v43 = vmax.f32 %v550_v36, 0.0 }
 0x13d   : > { %v502_v37 = vpop.f32.mrf.mxu0 }
 0x13e   : > { %v503_v38 = vadd.f32 %v502_v37, %v1669_v11  ;;  %v551_v39 = vpop.f32.mrf.mxu1 }
 0x13f   : > { %v552_v40 = vadd.f32 %v551_v39, %v1671_v12 }
 0x140   : > { %v585_v42 = vmax.f32 %v503_v38, 0.0 }
 0x141   : > { %v586_v44 = vmax.f32 %v552_v40, 0.0 }
 0x142   : > { %v603_v45 = vpack.c.bf16 %v585_v42, %v583_v41 }
 0x143   : > { %v604_v46 = vpack.c.bf16 %v586_v44, %v584_v43 }
 0x144   : > { %777 = vmatmul.bf16.gmra.mxu2 %v603_v45 }
 0x145   : > { %826 = vmatmul.bf16.gmra.mxu3 %v604_v46  ;;  %v505_v47 = vpop.f32.mrf.mxu0 }
 0x146   : > { %v554_v48 = vpop.f32.mrf.mxu1  ;;  %v506_v49 = vadd.f32 %v505_v47, %v1669_v11 }
 0x147   : > { %v555_v50 = vadd.f32 %v554_v48, %v1671_v12 }
 0x148   : > { %v587_v55 = vmax.f32 %v506_v49, 0.0 }
 0x149   : > { %v588_v57 = vmax.f32 %v555_v50, 0.0 }
 0x14d   : > { %v507_v51 = vpop.f32.mrf.mxu0 }
 0x14e   : > { %v508_v52 = vadd.f32 %v507_v51, %v1669_v11  ;;  %v556_v53 = vpop.f32.mrf.mxu1 }
 0x14f   : > { %v557_v54 = vadd.f32 %v556_v53, %v1671_v12 }
 0x150   : > { %v589_v56 = vmax.f32 %v508_v52, 0.0 }
 0x151   : > { %v590_v58 = vmax.f32 %v557_v54, 0.0 }
 0x152   : > { %v605_v59 = vpack.c.bf16 %v589_v56, %v587_v55 }
 0x153   : > { %v606_v60 = vpack.c.bf16 %v590_v58, %v588_v57 }
 0x154   : > { %782 = vmatmul.bf16.gmra.mxu2 %v605_v59 }
 0x155   : > { %831 = vmatmul.bf16.gmra.mxu3 %v606_v60 }
 0x167   : > { %v748_v62 = vpop.f32.mrf.mxu2 }
 0x168   : > { %v749_v63 = vadd.f32 %v1708_v61, %v748_v62  ;;  %v797_v11 = vpop.f32.mrf.mxu3 }
 0x16a   : > { %v798_v0 = vadd.f32 %v797_v11, %v749_v63 }
 0x16c   : > { %v837_v12 = vmax.f32 %v798_v0, 0.0 }
 0x16e   : > { %853 = vst [vmem:[%s1712_s16] sm:$0xff] %v837_v12 }
 0x16f   : > { %v750_v1 = vpop.f32.mrf.mxu2 }
 0x170   : > { %v751_v2 = vadd.f32 %v1708_v61, %v750_v1  ;;  %v799_v3 = vpop.f32.mrf.mxu3 }
 0x172   : > { %v800_v4 = vadd.f32 %v799_v3, %v751_v2 }
 0x174   : > { %v838_v5 = vmax.f32 %v800_v4, 0.0 }
 0x176   : > { %854 = vst [vmem:[%s1712_s16 + $0x8] sm:$0xff] %v838_v5 }
 0x177   : > { %v753_v6 = vpop.f32.mrf.mxu2 }
 0x178   : > { %v754_v7 = vadd.f32 %v1708_v61, %v753_v6  ;;  %v802_v8 = vpop.f32.mrf.mxu3 }
 0x17a   : > { %v803_v9 = vadd.f32 %v802_v8, %v754_v7 }
 0x17c   : > { %v839_v10 = vmax.f32 %v803_v9, 0.0 }
 0x17e   : > { %855 = vst [vmem:[%s1712_s16 + $0x10] sm:$0xff] %v839_v10 }
 0x17f   : > { %v755_v13 = vpop.f32.mrf.mxu2 }
 0x180   : > { %v756_v14 = vadd.f32 %v1708_v61, %v755_v13  ;;  %v804_v15 = vpop.f32.mrf.mxu3 }
 0x182   : > { %v805_v16 = vadd.f32 %v804_v15, %v756_v14 }
 0x184   : > { %v840_v17 = vmax.f32 %v805_v16, 0.0 }
 0x186   : > { %856 = vst [vmem:[%s1712_s16 + $0x18] sm:$0xff] %v840_v17 }
 0x187   : > { %v758_v18 = vpop.f32.mrf.mxu2 }
 0x188   : > { %v759_v19 = vadd.f32 %v1708_v61, %v758_v18  ;;  %v807_v20 = vpop.f32.mrf.mxu3 }
 0x18a   : > { %v808_v21 = vadd.f32 %v807_v20, %v759_v19 }
 0x18c   : > { %v841_v22 = vmax.f32 %v808_v21, 0.0 }
 0x18e   : > { %857 = vst [vmem:[%s1712_s16 + $0x20] sm:$0xff] %v841_v22 }
 0x18f   : > { %v760_v23 = vpop.f32.mrf.mxu2 }
 0x190   : > { %v761_v24 = vadd.f32 %v1708_v61, %v760_v23  ;;  %v809_v25 = vpop.f32.mrf.mxu3 }
 0x192   : > { %v810_v26 = vadd.f32 %v809_v25, %v761_v24 }
 0x194   : > { %v842_v27 = vmax.f32 %v810_v26, 0.0 }
 0x196   : > { %858 = vst [vmem:[%s1712_s16 + $0x28] sm:$0xff] %v842_v27 }
 0x197   : > { %v763_v28 = vpop.f32.mrf.mxu2 }
 0x198   : > { %v764_v29 = vadd.f32 %v1708_v61, %v763_v28  ;;  %v812_v30 = vpop.f32.mrf.mxu3 }
 0x19a   : > { %v813_v31 = vadd.f32 %v812_v30, %v764_v29 }
 0x19c   : > { %v843_v32 = vmax.f32 %v813_v31, 0.0 }
 0x19e   : > { %859 = vst [vmem:[%s1712_s16 + $0x30] sm:$0xff] %v843_v32 }
 0x19f   : > { %v765_v33 = vpop.f32.mrf.mxu2 }
 0x1a0   : > { %v766_v34 = vadd.f32 %v1708_v61, %v765_v33  ;;  %v814_v35 = vpop.f32.mrf.mxu3 }
 0x1a2   : > { %v815_v36 = vadd.f32 %v814_v35, %v766_v34 }
 0x1a4   : > { %v844_v37 = vmax.f32 %v815_v36, 0.0 }
 0x1a6   : > { %860 = vst [vmem:[%s1712_s16 + $0x38] sm:$0xff] %v844_v37 }
 0x1a7   : > { %v768_v38 = vpop.f32.mrf.mxu2 }
 0x1a8   : > { %v769_v39 = vadd.f32 %v1708_v61, %v768_v38  ;;  %v817_v40 = vpop.f32.mrf.mxu3 }
 0x1aa   : > { %v818_v41 = vadd.f32 %v817_v40, %v769_v39 }
 0x1ac   : > { %v845_v42 = vmax.f32 %v818_v41, 0.0 }
 0x1ae   : > { %861 = vst [vmem:[%s1712_s16 + $0x40] sm:$0xff] %v845_v42 }
 0x1af   : > { %v770_v43 = vpop.f32.mrf.mxu2 }
 0x1b0   : > { %v771_v44 = vadd.f32 %v1708_v61, %v770_v43  ;;  %v819_v45 = vpop.f32.mrf.mxu3 }
 0x1b2   : > { %v820_v46 = vadd.f32 %v819_v45, %v771_v44 }
 0x1b4   : > { %v846_v47 = vmax.f32 %v820_v46, 0.0 }
 0x1b6   : > { %862 = vst [vmem:[%s1712_s16 + $0x48] sm:$0xff] %v846_v47 }
 0x1b7   : > { %v773_v48 = vpop.f32.mrf.mxu2 }
 0x1b8   : > { %v774_v49 = vadd.f32 %v1708_v61, %v773_v48  ;;  %v822_v50 = vpop.f32.mrf.mxu3 }
 0x1ba   : > { %v823_v51 = vadd.f32 %v822_v50, %v774_v49 }
 0x1bc   : > { %v847_v52 = vmax.f32 %v823_v51, 0.0 }
 0x1be   : > { %863 = vst [vmem:[%s1712_s16 + $0x50] sm:$0xff] %v847_v52 }
 0x1bf   : > { %v775_v53 = vpop.f32.mrf.mxu2 }
 0x1c0   : > { %v776_v54 = vadd.f32 %v1708_v61, %v775_v53  ;;  %v824_v55 = vpop.f32.mrf.mxu3 }
 0x1c2   : > { %v825_v56 = vadd.f32 %v824_v55, %v776_v54 }
 0x1c4   : > { %v848_v57 = vmax.f32 %v825_v56, 0.0 }
 0x1c6   : > { %864 = vst [vmem:[%s1712_s16 + $0x58] sm:$0xff] %v848_v57 }
 0x1c7   : > { %v778_v58 = vpop.f32.mrf.mxu2 }
 0x1c8   : > { %v779_v59 = vadd.f32 %v1708_v61, %v778_v58  ;;  %v827_v60 = vpop.f32.mrf.mxu3 }
 0x1ca   : > { %v828_v62 = vadd.f32 %v827_v60, %v779_v59 }
 0x1cc   : > { %v849_v63 = vmax.f32 %v828_v62, 0.0 }
 0x1ce   : > { %865 = vst [vmem:[%s1712_s16 + $0x60] sm:$0xff] %v849_v63 }
 0x1cf   : > { %v780_v11 = vpop.f32.mrf.mxu2 }
 0x1d0   : > { %v781_v0 = vadd.f32 %v1708_v61, %v780_v11  ;;  %v829_v12 = vpop.f32.mrf.mxu3 }
 0x1d2   : > { %v830_v1 = vadd.f32 %v829_v12, %v781_v0 }
 0x1d4   : > { %v850_v2 = vmax.f32 %v830_v1, 0.0 }
 0x1d6   : > { %866 = vst [vmem:[%s1712_s16 + $0x68] sm:$0xff] %v850_v2 }
 0x1d7   : > { %v783_v3 = vpop.f32.mrf.mxu2 }
 0x1d8   : > { %v784_v4 = vadd.f32 %v1708_v61, %v783_v3  ;;  %v832_v5 = vpop.f32.mrf.mxu3 }
 0x1da   : > { %v833_v6 = vadd.f32 %v832_v5, %v784_v4 }
 0x1dc   : > { %v851_v7 = vmax.f32 %v833_v6, 0.0 }
 0x1de   : > { %867 = vst [vmem:[%s1712_s16 + $0x70] sm:$0xff] %v851_v7 }
 0x1df   : > { %v785_v8 = vpop.f32.mrf.mxu2 }
 0x1e0   : > { %v786_v9 = vadd.f32 %v1708_v61, %v785_v8  ;;  %v834_v10 = vpop.f32.mrf.mxu3 }
 0x1e2   : > { %v835_v13 = vadd.f32 %v834_v10, %v786_v9 }
 0x1e4   : > { %v852_v14 = vmax.f32 %v835_v13, 0.0 }
 0x1e6   : > { %868 = vst [vmem:[%s1712_s16 + $0x78] sm:$0xff] %v852_v14 }
 0x1e7   : > { %1440 = shalt.err (!%p1437_p10)
}
 0x1e8   : > { %s1496_s17 = smov 128   ;;  %s1497_s28 = smov 8  }
 0x1e9   : > { %1223 = dma.vmem_to_hbm [thread:$0]  (%p1613_p3), %s883_s12, 2048, %s885_s14, %s870_s15, %s1496_s17, %s1496_s17, %s1497_s28  }
 0x1ea PF: > { %s899_s16 = sand.u32 1, %s1475_s18   ;;  %p1793_p12 = scmp.ge.s32.totalorder %s1487_s21, 2 }
 0x1eb   : > { %s900_s23 = scalar_lea.sflag [#allocation4], %s899_s16 }
 0x1ec   : > { %p1240_p13 = pnand %p1793_p12, %p1563_p6 }
 0x1ee   : > { %p1241_p0 = pneg %p1240_p13 }
 0x1f0   : > { %1470 = dma.done.wait (%p1241_p0), %s900_s23, 2048  }
 0x1f1   : > { %1472 = vsyncadd (%p1241_p0), %s900_s23, 4294965248  ;;  %p20_p5 = scmp.ge.s32.totalorder %s1600_s30, 4   ;;  %s1794_s18 = smov %s1479_s19 }
 0x1f2   : > { %s1795_s19 = smov %s1483_s20  ;;  %s1796_s20 = smov %s1609_s9 }
 0x1f3   : > { %s1797_s21 = smov %s1600_s30  ;;  %22 = sbr.rel (!%p20_p5) target bundleno = 7 (0x7), region = 97 }
 0x1f8   :  { %906 = vsyncpa [#allocation3], 1 }
 0x1f9   :  { %908 = vsyncpa [#allocation3 + $0x1], 1 }
 0x1fa   :  { %909 = vsyncpa [#allocation6], 1 }
 0x1fb   :  { %910 = vsyncpa [#allocation9], 1 }
 0x1fc   :  { %911 = vsyncpa [#allocation4], 1 }
 0x1fd   :  { %913 = vsyncpa [#allocation4 + $0x1], 1 }

// kernel: tpu_custom_call.1
= control target key start
LH: loop header
LB: loop body
LE: loop exit
PB: predicated region body
PF: predicated region fallthrough
CT: control target
= control target key end

     0   :  { %10 = vsyncpa [#allocation3], 0  ;;  %s1779_s0 = inlined_call_operand.hbm [shape: bf16[256,128], index: 0, kind: input, shape index: {}]   ;;  %s1780_s1 = inlined_call_operand.hbm [shape: bf16[128,256], index: 1, kind: input, shape index: {}]   ;;  %s1781_s2 = inlined_call_operand.hbm [shape: f32[1,256], index: 2, kind: input, shape index: {}]   ;;  %s1782_s3 = inlined_call_operand.hbm [shape: bf16[256,128], index: 3, kind: input, shape index: {}]   ;;  %s1783_s4 = inlined_call_operand.vmem [shape: f32[1,128], index: 4, kind: input, shape index: {}]   ;;  %s1784_s5 = inlined_call_operand.hbm [shape: f32[256,128], index: 5, kind: output, shape index: {}]  }
   0x1   :  { %12 = vsyncpa [#allocation3 + $0x1], 0 }
   0x2   :  { %13 = vsyncpa [#allocation6], 0 }
   0x3   :  { %14 = vsyncpa [#allocation9], 0 }
   0x4   :  { %15 = vsyncpa [#allocation4], 0 }
   0x5   :  { %17 = vsyncpa [#allocation4 + $0x1], 0  ;;  %s1528_s18 = smov 0   ;;  %s1530_s19 = smov 0  }
   0x6   :  { %s1532_s20 = smov 0   ;;  %s1534_s21 = smov 0  }
   0x7 LB: > { %s1549_s22 = sadd.s32 4294967295, %s1487_s21   ;;  %s987_s23 = sadd.s32 4294967294, %s1487_s21   ;;  %s1487_s21 = sphi %s1534_s21, %s1797_s21   ;;  %s1483_s20 = sphi %s1532_s20, %s1796_s20   ;;  %s1479_s19 = sphi %s1530_s19, %s1795_s19   ;;  %s1475_s18 = sphi %s1528_s18, %s1794_s18  }
   0x8   : > { %p43_p0 = scmp.ne.s32.totalorder %s1479_s19, %s1475_s18  ;;  %p44_p1 = scmp.eq.s32.totalorder %s1549_s22, 0 }
   0x9   : > { %p151_p2 = scmp.eq.s32.totalorder %s1549_s22, 1  ;;  %p157_p3 = scmp.eq.s32.totalorder %s987_s23, 1 }
   0xa   : > { %p1558_p4 = por %p44_p1, %p43_p0  ;;  %p988_p5 = scmp.ge.s32.totalorder %s1487_s21, 1 }
   0xb   : > { %p1563_p6 = por %p157_p3, %p43_p0  ;;  %p164_p7 = scmp.lt.s32.totalorder %s1487_s21, 3 }
   0xc   : > { %s175_s28 = sshll.u32 %s1780_s1, 4  ;;  %s1489_s30 = smov [#allocation5]   ;;  %s176_s28 = int_to_ptr.hbm [resolvable:$true] %s175_s28 }
   0xd   : > { %p1571_p8 = pnand %p988_p5, %p164_p7  ;;  %s177_s6 = sshll.u32 %s1489_s30, 4  ;;  %s178_s6 = int_to_ptr.vmem [resolvable:$true] %s177_s6 }
   0xe   : > { %s190_s10 = sshll.u32 %s1781_s2, 4  ;;  %s1490_s11 = smov 128   ;;  %s191_s10 = int_to_ptr.hbm [resolvable:$true] %s190_s10 }
   0xf   : > { %p1225_p9 = pneg %p1571_p8  ;;  %s1491_s12 = smov 8  }
  0x10   : > { %s1492_s13 = smov [#allocation7]   ;;  %s201_s17 = sshll.u32 %s1782_s3, 4  ;;  %s202_s17 = int_to_ptr.hbm [resolvable:$true] %s201_s17 }
  0x11   : > { %p1579_p10 = pnand %p1225_p9, %p44_p1  ;;  %s192_s14 = sshll.u32 %s1492_s13, 4  ;;  %s193_s14 = int_to_ptr.vmem [resolvable:$true] %s192_s14 }
  0x12   : > { %s1493_s23 = smov [#allocation8]   ;;  %s1785_s27 = smov 64  }
  0x13   : > { %1228 = dma.hbm_to_vmem [thread:$0]  (!%p1579_p10), %s176_s28, 2048, %s178_s6, [#allocation6], %s1490_s11, %s1490_s11, %s1491_s12  }
  0x14   : > { %1231 = dma.hbm_to_vmem [thread:$0]  (!%p1579_p10), %s191_s10, 32, %s193_s14, [#allocation6]  }
  0x15   : > { %s203_s26 = sshll.u32 %s1493_s23, 4  ;;  %s1495_s28 = smov 4   ;;  %s204_s26 = int_to_ptr.vmem [resolvable:$true] %s203_s26 }
  0x16   : > { %1234 = dma.hbm_to_vmem [thread:$0]  (!%p1579_p10), %s202_s17, 2048, %s204_s26, [#allocation9], %s1785_s27, %s1785_s27, %s1495_s28  }
  0x17   : > { %s1600_s30 = sadd.s32 1, %s1487_s21   ;;  %s30_s8 = sadd.s32 1, %s1483_s20 }
  0x18   : > { %s27_s6 = ssub.s32 %s1487_s21, %s1600_s30  ;;  %p37_p13 = scmp.ne.s32.totalorder %s1483_s20, %s1479_s19 }
  0x19   : > { %p28_p12 = scmp.eq.s32.totalorder %s27_s6, 0  ;;  %p38_p0 = scmp.eq.s32.totalorder %s1487_s21, 0 }
  0x1a   : > { %p1613_p3 = por %p151_p2, %p37_p13  ;;  %p1246_p5 = scmp.lt.s32.totalorder %s1487_s21, 2 }
  0x1b   : > { %s1609_s9 = scalar_select %p28_p12, %s1483_s20, %s30_s8  }
  0x1c   : > { %s220_s7 = sand.u32 1, %s1483_s20   ;;  %s1167_s11 = sshll.u32 %s1487_s21, 6 }
  0x1d   : > { %p39_p7 = por %p38_p0, %p37_p13  ;;  %s993_s12 = sshll.u32 %s220_s7, 6 }
  0x1e   : > { %s229_s15 = scalar_lea.hbm %s1779_s0, %s1167_s11  ;;  %s224_s17 = scalar_lea.vmem [#allocation2], %s993_s12 }
  0x1f   : > { %s230_s16 = sshll.u32 %s229_s15, 4  ;;  %s232_s23 = sshll.u32 %s224_s17, 4  ;;  %s231_s16 = int_to_ptr.hbm [resolvable:$true] %s230_s16  ;;  %s233_s23 = int_to_ptr.vmem [resolvable:$true] %s232_s23 }
  0x20   : > { %p1623_p9 = pnand %p1246_p5, %p39_p7  ;;  %s221_s6 = scalar_lea.sflag [#allocation3], %s220_s7 }
  0x21   : > { %s1383_s8 = sshra.s32 %s231_s16, 4  ;;  %s1390_s12 = scalar_lea.hbm %s1779_s0, 128  ;;  %s1384_s8 = int_to_ptr.hbm [resolvable:$true] %s1383_s8 }
  0x22   : > { %s1385_s27 = scalar_lea.hbm %s1384_s8, 64  ;;  %p1387_p10 = pneg %p1623_p9 }
  0x23   : > { %p1386_p2 = scmp.ne.s32.totalorder %s1384_s8, %s1385_s27  ;;  %p1391_p0 = scmp.lt.s32.totalorder %s1384_s8, %s1779_s0 }
  0x24   : > { %p1392_p5 = scmp.lt.s32.totalorder %s1390_s12, %s1385_s27 }
  0x25   : > { %p1388_p12 = pnand %p1387_p10, %p1386_p2 }
  0x26   : > { %p1393_p7 = por %p1392_p5, %p1391_p0 }
  0x27   : > { %p1389_p13 = pneg %p1388_p12 }
  0x29   : > { %p1394_p11 = pnand %p1393_p7, %p1389_p13 }
  0x2b   : > { %1397 = shalt.err (!%p1394_p11)
}
  0x2c   : > { %s1792_s7 = smov 64   ;;  %244 = sbr.rel (%p1571_p8) target bundleno = 490 (0x1ea), region = 40 }
  0x2d   : > { %1238 = dma.hbm_to_vmem [thread:$0]  (!%p1623_p9), %s231_s16, 1024, %s233_s23, %s221_s6, %s1792_s7, %s1792_s7, %s1495_s28  }
  0x2e   : > { %s1643_s17 = sand.u32 (!%p1571_p8), 1, %s1479_s19  }
  0x2f   : > { %s997_s8 = sshll.u32 (!%p1571_p8), %s1643_s17, 6  ;;  %s247_s27 = scalar_lea.sflag (!%p1571_p8), [#allocation3], %s1643_s17 }
  0x30   : > { %s1647_s11 = scalar_lea.vmem (!%p1571_p8), [#allocation2], %s997_s8 }
  0x31   : > { %1458 = dma.done.wait (%p1558_p4), %s247_s27, 1024  }
  0x32   : > { %1460 = vsyncadd (%p1558_p4), %s247_s27, 4294966272 }
  0x33   : > { %1462 = dma.done.wait (%p44_p1), [#allocation6], 2080  }
  0x34   : > { %1464 = vsyncadd (%p44_p1), [#allocation6], 4294965216 }
  0x35   : > { %1466 = dma.done.wait (%p44_p1), [#allocation9], 2048  }
  0x36   : > { %1468 = vsyncadd (%p44_p1), [#allocation9], 4294965248  ;;  %v1092_v0 = vld [vmem:[#allocation5 + $0x70] sm:$0xf]  ;;  %v1191_v1 = vld [vmem:[#allocation5 + $0x74] sm:$0xf0] }
  0x37   : > { %v1190_v2 = vld [vmem:[#allocation5 + $0x74] sm:$0xf]  ;;  %v1093_v3 = vor.u32 %v1191_v1, %v1092_v0  ;;  %v1094_v4 = vld [vmem:[#allocation5 + $0x78] sm:$0xf0]  ;;  %v1084_v5 = vld [vmem:[#allocation5 + $0x60] sm:$0xf] }
  0x38   : > { %v1189_v6 = vld [vmem:[#allocation5 + $0x64] sm:$0xf0]  ;;  %v1097_v7 = vor.u32 %v1190_v2, %v1094_v4  ;;  %v1188_v8 = vld [vmem:[#allocation5 + $0x64] sm:$0xf]  ;;  %v1086_v9 = vld [vmem:[#allocation5 + $0x68] sm:$0xf0] }
  0x39   : > { %461 = vmatpush.bf16.msra.mxu0 %v1093_v3  ;;  %v1085_v10 = vor.u32 %v1189_v6, %v1084_v5  ;;  %v1089_v11 = vor.u32 %v1188_v8, %v1086_v9  ;;  %v1076_v12 = vld [vmem:[#allocation5 + $0x50] sm:$0xf]  ;;  %v1187_v13 = vld [vmem:[#allocation5 + $0x54] sm:$0xf0]  ;;  %v1186_v14 = vld [vmem:[#allocation5 + $0x54] sm:$0xf] }
  0x3a   : > { %510 = vmatpush.bf16.msra.mxu1 %v1097_v7  ;;  %v1078_v15 = vld [vmem:[#allocation5 + $0x58] sm:$0xf0]  ;;  %v1077_v16 = vor.u32 %v1187_v13, %v1076_v12  ;;  %v1068_v18 = vld [vmem:[#allocation5 + $0x40] sm:$0xf]  ;;  %v1185_v19 = vld [vmem:[#allocation5 + $0x44] sm:$0xf0] }
  0x3b   : > { %v1081_v17 = vor.u32 %v1186_v14, %v1078_v15  ;;  %v1184_v20 = vld [vmem:[#allocation5 + $0x44] sm:$0xf]  ;;  %v1070_v21 = vld [vmem:[#allocation5 + $0x48] sm:$0xf0]  ;;  %v1069_v22 = vor.u32 %v1185_v19, %v1068_v18  ;;  %v1060_v24 = vld [vmem:[#allocation5 + $0x30] sm:$0xf] }
  0x3c   : > { %v1073_v23 = vor.u32 %v1184_v20, %v1070_v21  ;;  %v1183_v25 = vld [vmem:[#allocation5 + $0x34] sm:$0xf0]  ;;  %v1182_v26 = vld [vmem:[#allocation5 + $0x34] sm:$0xf]  ;;  %v1062_v27 = vld [vmem:[#allocation5 + $0x38] sm:$0xf0] }
  0x3d   : > { %462 = vmatpush.bf16.msra.mxu0 %v1085_v10  ;;  %v1061_v28 = vor.u32 %v1183_v25, %v1060_v24  ;;  %v1065_v29 = vor.u32 %v1182_v26, %v1062_v27  ;;  %v1052_v30 = vld [vmem:[#allocation5 + $0x20] sm:$0xf]  ;;  %v1181_v31 = vld [vmem:[#allocation5 + $0x24] sm:$0xf0]  ;;  %v1180_v32 = vld [vmem:[#allocation5 + $0x24] sm:$0xf] }
  0x3e   : > { %511 = vmatpush.bf16.msra.mxu1 %v1089_v11  ;;  %v1054_v33 = vld [vmem:[#allocation5 + $0x28] sm:$0xf0]  ;;  %v1053_v34 = vor.u32 %v1181_v31, %v1052_v30  ;;  %v1044_v36 = vld [vmem:[#allocation5 + $0x10] sm:$0xf]  ;;  %v1179_v37 = vld [vmem:[#allocation5 + $0x14] sm:$0xf0] }
  0x3f   : > { %v1057_v35 = vor.u32 %v1180_v32, %v1054_v33  ;;  %v1178_v38 = vld [vmem:[#allocation5 + $0x14] sm:$0xf]  ;;  %v1046_v39 = vld [vmem:[#allocation5 + $0x18] sm:$0xf0]  ;;  %v1045_v40 = vor.u32 %v1179_v37, %v1044_v36  ;;  %v1036_v42 = vld [vmem:[#allocation5] sm:$0xf] }
  0x40   : > { %v1049_v41 = vor.u32 %v1178_v38, %v1046_v39  ;;  %v1177_v43 = vld [vmem:[#allocation5 + $0x4] sm:$0xf0]  ;;  %v1176_v44 = vld [vmem:[#allocation5 + $0x4] sm:$0xf]  ;;  %v1038_v45 = vld [vmem:[#allocation5 + $0x8] sm:$0xf0] }
  0x41   : > { %463 = vmatpush.bf16.msra.mxu0 %v1077_v16  ;;  %v1037_v46 = vor.u32 %v1177_v43, %v1036_v42  ;;  %v1041_v47 = vor.u32 %v1176_v44, %v1038_v45  ;;  %v1168_v48 = vld [vmem:[%s1647_s11] sm:$0xff]  ;;  %v1169_v49 = vld [vmem:[%s1647_s11 + $0x8] sm:$0xff]  ;;  %v1170_v50 = vld [vmem:[%s1647_s11 + $0x10] sm:$0xff]  ;;  %s1001_s28 = sshll.u32 %s1643_s17, 7  ;;  %s1208_s23 = sshll.u32 %s1549_s22, 7 }
  0x42   : > { %512 = vmatpush.bf16.msra.mxu1 %v1081_v17  ;;  %v1171_v51 = vld [vmem:[%s1647_s11 + $0x18] sm:$0xff]  ;;  %v1172_v52 = vld [vmem:[%s1647_s11 + $0x20] sm:$0xff]  ;;  %v1173_v55 = vld [vmem:[%s1647_s11 + $0x28] sm:$0xff]  ;;  %s1712_s16 = scalar_lea.vmem [#allocation10], %s1001_s28  ;;  %s881_s13 = scalar_lea.hbm %s1784_s5, %s1208_s23 }
  0x43   : > { %v1199_v53 = vld [vmem:[#allocation8 + $0x38] sm:$0xff]  ;;  %v1198_v56 = vld [vmem:[#allocation8 + $0x30] sm:$0xff]  ;;  %v1197_v58 = vld [vmem:[#allocation8 + $0x28] sm:$0xff]  ;;  %s882_s12 = sshll.u32 %s1712_s16, 4  ;;  %s884_s14 = sshll.u32 %s881_s13, 4  ;;  %s883_s12 = int_to_ptr.vmem [resolvable:$true] %s882_s12  ;;  %s885_s14 = int_to_ptr.hbm [resolvable:$true] %s884_s14 }
  0x44   : > { %v1207_v54 = vld [vmem:[#allocation8 + $0x78] sm:$0xff]  ;;  %739 = vmatpush.bf16.msra.mxu2 %v1199_v53  ;;  %v1206_v57 = vld [vmem:[#allocation8 + $0x70] sm:$0xff]  ;;  %v1205_v59 = vld [vmem:[#allocation8 + $0x68] sm:$0xff]  ;;  %s870_s15 = scalar_lea.sflag [#allocation4], %s1643_s17  ;;  %s1427_s22 = sshra.s32 %s885_s14, 4  ;;  %s1428_s22 = int_to_ptr.hbm [resolvable:$true] %s1427_s22 }
  0x45   : > { %464 = vmatpush.bf16.msra.mxu0 %v1069_v22  ;;  %788 = vmatpush.bf16.msra.mxu3 %v1207_v54  ;;  %v1196_v60 = vld [vmem:[#allocation8 + $0x20] sm:$0xff]  ;;  %v1174_v62 = vld [vmem:[%s1647_s11 + $0x30] sm:$0xff]  ;;  %v1195_v63 = vld [vmem:[#allocation8 + $0x18] sm:$0xff]  ;;  %s1429_s7 = scalar_lea.hbm %s1428_s22, 128  ;;  %p1434_p11 = scmp.lt.s32.totalorder %s1428_s22, %s1784_s5 }
  0x46   : > { %513 = vmatpush.bf16.msra.mxu1 %v1073_v23  ;;  %v1204_v61 = vld [vmem:[#allocation8 + $0x60] sm:$0xff]  ;;  %v1203_v0 = vld [vmem:[#allocation8 + $0x58] sm:$0xff]  ;;  %v1194_v1 = vld [vmem:[#allocation8 + $0x10] sm:$0xff]  ;;  %p1430_p1 = scmp.ne.s32.totalorder %s1428_s22, %s1429_s7 }
  0x47   : > { %v1202_v2 = vld [vmem:[#allocation8 + $0x50] sm:$0xff]  ;;  %v1193_v3 = vld [vmem:[#allocation8 + $0x8] sm:$0xff]  ;;  %v1192_v5 = vld [vmem:[#allocation8] sm:$0xff] }
  0x48   : > { %740 = vmatpush.bf16.msra.mxu2 %v1198_v56  ;;  %v1201_v4 = vld [vmem:[#allocation8 + $0x48] sm:$0xff]  ;;  %v1200_v6 = vld [vmem:[#allocation8 + $0x40] sm:$0xff]  ;;  %v1175_v7 = vld [vmem:[%s1647_s11 + $0x38] sm:$0xff]  ;;  %p1431_p4 = pnand %p1430_p1, %p1613_p3  ;;  %s1433_s11 = scalar_lea.hbm %s1784_s5, 256 }
  0x49   : > { %465 = vmatpush.bf16.msra.mxu0 %v1061_v28  ;;  %789 = vmatpush.bf16.msra.mxu3 %v1206_v57  ;;  %v327_v8 = vld [vmem:[#allocation7] sm:$0x3]  ;;  %p1435_p9 = scmp.lt.s32.totalorder %s1433_s11, %s1429_s7 }
  0x4a   : > { %514 = vmatpush.bf16.msra.mxu1 %v1065_v29  ;;  %v1669_v11 = vperm.slane %v327_v8, 0  ;;  %v1671_v12 = vperm.slane %v327_v8, 1  ;;  %p1432_p8 = pneg %p1431_p4 }
  0x4b   : > { %p1436_p2 = por %p1435_p9, %p1434_p11 }
  0x4c   : > { %741 = vmatpush.bf16.msra.mxu2 %v1197_v58 }
  0x4d   : > { %466 = vmatpush.bf16.msra.mxu0 %v1053_v34  ;;  %790 = vmatpush.bf16.msra.mxu3 %v1205_v59  ;;  %p1437_p10 = pnand %p1436_p2, %p1432_p8 }
  0x4e   : > { %515 = vmatpush.bf16.msra.mxu1 %v1057_v35 }
  0x50   : > { %742 = vmatpush.bf16.msra.mxu2 %v1196_v60 }
  0x51   : > { %467 = vmatpush.bf16.msra.mxu0 %v1045_v40  ;;  %791 = vmatpush.bf16.msra.mxu3 %v1204_v61 }
  0x52   : > { %516 = vmatpush.bf16.msra.mxu1 %v1049_v41 }
  0x54   : > { %743 = vmatpush.bf16.msra.mxu2 %v1195_v63 }
  0x55   : > { %468 = vmatpush.bf16.msra.mxu0 %v1037_v46  ;;  %792 = vmatpush.bf16.msra.mxu3 %v1203_v0 }
  0x56   : > { %517 = vmatpush.bf16.msra.mxu1 %v1041_v47 }
  0x58   : > { %469 = vmatmul.bf16.vlgmr.msra.gmra.mxu0 %v1168_v48  ;;  %744 = vmatpush.bf16.msra.mxu2 %v1194_v1 }
  0x59   : > { %518 = vmatmul.bf16.vlgmr.msra.gmra.mxu1 %v1168_v48  ;;  %793 = vmatpush.bf16.msra.mxu3 %v1202_v2 }
  0x5c   : > { %745 = vmatpush.bf16.msra.mxu2 %v1193_v3 }
  0x5d   : > { %794 = vmatpush.bf16.msra.mxu3 %v1201_v4 }
  0x60   : > { %746 = vmatpush.bf16.msra.mxu2 %v1192_v5 }
  0x61   : > { %795 = vmatpush.bf16.msra.mxu3 %v1200_v6 }
  0x68   : > { %474 = vmatmul.bf16.gmra.mxu0 %v1169_v49 }
  0x69   : > { %523 = vmatmul.bf16.gmra.mxu1 %v1169_v49 }
  0x78   : > { %479 = vmatmul.bf16.gmra.mxu0 %v1170_v50 }
  0x79   : > { %528 = vmatmul.bf16.gmra.mxu1 %v1170_v50 }
  0x88   : > { %484 = vmatmul.bf16.gmra.mxu0 %v1171_v51 }
  0x89   : > { %533 = vmatmul.bf16.gmra.mxu1 %v1171_v51 }
  0x98   : > { %489 = vmatmul.bf16.gmra.mxu0 %v1172_v52 }
  0x99   : > { %538 = vmatmul.bf16.gmra.mxu1 %v1172_v52 }
  0xa8   : > { %494 = vmatmul.bf16.gmra.mxu0 %v1173_v55 }
  0xa9   : > { %543 = vmatmul.bf16.gmra.mxu1 %v1173_v55 }
  0xb8   : > { %499 = vmatmul.bf16.gmra.mxu0 %v1174_v62 }
  0xb9   : > { %548 = vmatmul.bf16.gmra.mxu1 %v1174_v62 }
  0xc8   : > { %504 = vmatmul.bf16.gmra.mxu0 %v1175_v7 }
  0xc9   : > { %553 = vmatmul.bf16.gmra.mxu1 %v1175_v7 }
  0xd5   : > { %v470_v9 = vpop.f32.mrf.mxu0 }
  0xd6   : > { %v519_v10 = vpop.f32.mrf.mxu1  ;;  %v471_v13 = vadd.f32 %v470_v9, %v1669_v11 }
  0xd7   : > { %v520_v14 = vadd.f32 %v519_v10, %v1671_v12 }
  0xd8   : > { %v559_v19 = vmax.f32 %v471_v13, 0.0 }
  0xd9   : > { %v560_v21 = vmax.f32 %v520_v14, 0.0 }
  0xdd   : > { %v472_v15 = vpop.f32.mrf.mxu0 }
  0xde   : > { %v473_v16 = vadd.f32 %v472_v15, %v1669_v11  ;;  %v521_v17 = vpop.f32.mrf.mxu1 }
  0xdf   : > { %v522_v18 = vadd.f32 %v521_v17, %v1671_v12 }
  0xe0   : > { %v561_v20 = vmax.f32 %v473_v16, 0.0 }
  0xe1   : > { %v562_v22 = vmax.f32 %v522_v18, 0.0 }
  0xe2   : > { %v591_v23 = vpack.c.bf16 %v561_v20, %v559_v19 }
  0xe3   : > { %v592_v24 = vpack.c.bf16 %v562_v22, %v560_v21 }
  0xe4   : > { %747 = vmatmul.bf16.vlgmr.msra.gmra.mxu2 %v591_v23 }
  0xe5   : > { %796 = vmatmul.bf16.vlgmr.msra.gmra.mxu3 %v592_v24  ;;  %v475_v25 = vpop.f32.mrf.mxu0 }
  0xe6   : > { %v524_v26 = vpop.f32.mrf.mxu1  ;;  %v476_v27 = vadd.f32 %v475_v25, %v1669_v11 }
  0xe7   : > { %v525_v28 = vadd.f32 %v524_v26, %v1671_v12 }
  0xe8   : > { %v563_v33 = vmax.f32 %v476_v27, 0.0 }
  0xe9   : > { %v564_v35 = vmax.f32 %v525_v28, 0.0 }
  0xed   : > { %v477_v29 = vpop.f32.mrf.mxu0 }
  0xee   : > { %v478_v30 = vadd.f32 %v477_v29, %v1669_v11  ;;  %v526_v31 = vpop.f32.mrf.mxu1 }
  0xef   : > { %v527_v32 = vadd.f32 %v526_v31, %v1671_v12 }
  0xf0   : > { %v565_v34 = vmax.f32 %v478_v30, 0.0 }
  0xf1   : > { %v566_v36 = vmax.f32 %v527_v32, 0.0 }
  0xf2   : > { %v593_v37 = vpack.c.bf16 %v565_v34, %v563_v33 }
  0xf3   : > { %v594_v38 = vpack.c.bf16 %v566_v36, %v564_v35 }
  0xf4   : > { %752 = vmatmul.bf16.gmra.mxu2 %v593_v37 }
  0xf5   : > { %801 = vmatmul.bf16.gmra.mxu3 %v594_v38  ;;  %v480_v39 = vpop.f32.mrf.mxu0 }
  0xf6   : > { %v529_v40 = vpop.f32.mrf.mxu1  ;;  %v481_v41 = vadd.f32 %v480_v39, %v1669_v11 }
  0xf7   : > { %v530_v42 = vadd.f32 %v529_v40, %v1671_v12 }
  0xf8   : > { %v567_v47 = vmax.f32 %v481_v41, 0.0 }
  0xf9   : > { %v568_v49 = vmax.f32 %v530_v42, 0.0 }
  0xfd   : > { %v482_v43 = vpop.f32.mrf.mxu0 }
  0xfe   : > { %v483_v44 = vadd.f32 %v482_v43, %v1669_v11  ;;  %v531_v45 = vpop.f32.mrf.mxu1 }
  0xff   : > { %v532_v46 = vadd.f32 %v531_v45, %v1671_v12 }
 0x100   : > { %v569_v48 = vmax.f32 %v483_v44, 0.0 }
 0x101   : > { %v570_v50 = vmax.f32 %v532_v46, 0.0 }
 0x102   : > { %v595_v51 = vpack.c.bf16 %v569_v48, %v567_v47 }
 0x103   : > { %v596_v52 = vpack.c.bf16 %v570_v50, %v568_v49 }
 0x104   : > { %757 = vmatmul.bf16.gmra.mxu2 %v595_v51 }
 0x105   : > { %806 = vmatmul.bf16.gmra.mxu3 %v596_v52  ;;  %v485_v53 = vpop.f32.mrf.mxu0 }
 0x106   : > { %v534_v54 = vpop.f32.mrf.mxu1  ;;  %v486_v55 = vadd.f32 %v485_v53, %v1669_v11 }
 0x107   : > { %v535_v56 = vadd.f32 %v534_v54, %v1671_v12 }
 0x108   : > { %v571_v61 = vmax.f32 %v486_v55, 0.0 }
 0x109   : > { %v572_v63 = vmax.f32 %v535_v56, 0.0 }
 0x10d   : > { %v487_v57 = vpop.f32.mrf.mxu0 }
 0x10e   : > { %v488_v58 = vadd.f32 %v487_v57, %v1669_v11  ;;  %v536_v59 = vpop.f32.mrf.mxu1 }
 0x10f   : > { %v537_v60 = vadd.f32 %v536_v59, %v1671_v12 }
 0x110   : > { %v573_v62 = vmax.f32 %v488_v58, 0.0 }
 0x111   : > { %v574_v0 = vmax.f32 %v537_v60, 0.0 }
 0x112   : > { %v597_v1 = vpack.c.bf16 %v573_v62, %v571_v61  ;;  %v1708_v61 = vld [vmem:[%s1783_s4] ss:$0 sm:$0xff] }
 0x113   : > { %v598_v2 = vpack.c.bf16 %v574_v0, %v572_v63 }
 0x114   : > { %762 = vmatmul.bf16.gmra.mxu2 %v597_v1 }
 0x115   : > { %811 = vmatmul.bf16.gmra.mxu3 %v598_v2  ;;  %v490_v3 = vpop.f32.mrf.mxu0 }
 0x116   : > { %v539_v4 = vpop.f32.mrf.mxu1  ;;  %v491_v5 = vadd.f32 %v490_v3, %v1669_v11 }
 0x117   : > { %v540_v6 = vadd.f32 %v539_v4, %v1671_v12 }
 0x118   : > { %v575_v13 = vmax.f32 %v491_v5, 0.0 }
 0x119   : > { %v576_v15 = vmax.f32 %v540_v6, 0.0 }
 0x11d   : > { %v492_v7 = vpop.f32.mrf.mxu0 }
 0x11e   : > { %v493_v8 = vadd.f32 %v492_v7, %v1669_v11  ;;  %v541_v9 = vpop.f32.mrf.mxu1 }
 0x11f   : > { %v542_v10 = vadd.f32 %v541_v9, %v1671_v12 }
 0x120   : > { %v577_v14 = vmax.f32 %v493_v8, 0.0 }
 0x121   : > { %v578_v16 = vmax.f32 %v542_v10, 0.0 }
 0x122   : > { %v599_v17 = vpack.c.bf16 %v577_v14, %v575_v13 }
 0x123   : > { %v600_v18 = vpack.c.bf16 %v578_v16, %v576_v15 }
 0x124   : > { %767 = vmatmul.bf16.gmra.mxu2 %v599_v17 }
 0x125   : > { %816 = vmatmul.bf16.gmra.mxu3 %v600_v18  ;;  %v495_v19 = vpop.f32.mrf.mxu0 }
 0x126   : > { %v544_v20 = vpop.f32.mrf.mxu1  ;;  %v496_v21 = vadd.f32 %v495_v19, %v1669_v11 }
 0x127   : > { %v545_v22 = vadd.f32 %v544_v20, %v1671_v12 }
 0x128   : > { %v579_v27 = vmax.f32 %v496_v21, 0.0 }
 0x129   : > { %v580_v29 = vmax.f32 %v545_v22, 0.0 }
 0x12d   : > { %v497_v23 = vpop.f32.mrf.mxu0 }
 0x12e   : > { %v498_v24 = vadd.f32 %v497_v23, %v1669_v11  ;;  %v546_v25 = vpop.f32.mrf.mxu1 }
 0x12f   : > { %v547_v26 = vadd.f32 %v546_v25, %v1671_v12 }
 0x130   : > { %v581_v28 = vmax.f32 %v498_v24, 0.0 }
 0x131   : > { %v582_v30 = vmax.f32 %v547_v26, 0.0 }
 0x132   : > { %v601_v31 = vpack.c.bf16 %v581_v28, %v579_v27 }
 0x133   : > { %v602_v32 = vpack.c.bf16 %v582_v30, %v580_v29 }
 0x134   : > { %772 = vmatmul.bf16.gmra.mxu2 %v601_v31 }
 0x135   : > { %821 = vmatmul.bf16.gmra.mxu3 %v602_v32  ;;  %v500_v33 = vpop.f32.mrf.mxu0 }
 0x136   : > { %v549_v34 = vpop.f32.mrf.mxu1  ;;  %v501_v35 = vadd.f32 %v500_v33, %v1669_v11 }
 0x137   : > { %v550_v36 = vadd.f32 %v549_v34, %v1671_v12 }
 0x138   : > { %v583_v41 = vmax.f32 %v501_v35, 0.0 }
 0x139   : > { %v584_v43 = vmax.f32 %v550_v36, 0.0 }
 0x13d   : > { %v502_v37 = vpop.f32.mrf.mxu0 }
 0x13e   : > { %v503_v38 = vadd.f32 %v502_v37, %v1669_v11  ;;  %v551_v39 = vpop.f32.mrf.mxu1 }
 0x13f   : > { %v552_v40 = vadd.f32 %v551_v39, %v1671_v12 }
 0x140   : > { %v585_v42 = vmax.f32 %v503_v38, 0.0 }
 0x141   : > { %v586_v44 = vmax.f32 %v552_v40, 0.0 }
 0x142   : > { %v603_v45 = vpack.c.bf16 %v585_v42, %v583_v41 }
 0x143   : > { %v604_v46 = vpack.c.bf16 %v586_v44, %v584_v43 }
 0x144   : > { %777 = vmatmul.bf16.gmra.mxu2 %v603_v45 }
 0x145   : > { %826 = vmatmul.bf16.gmra.mxu3 %v604_v46  ;;  %v505_v47 = vpop.f32.mrf.mxu0 }
 0x146   : > { %v554_v48 = vpop.f32.mrf.mxu1  ;;  %v506_v49 = vadd.f32 %v505_v47, %v1669_v11 }
 0x147   : > { %v555_v50 = vadd.f32 %v554_v48, %v1671_v12 }
 0x148   : > { %v587_v55 = vmax.f32 %v506_v49, 0.0 }
 0x149   : > { %v588_v57 = vmax.f32 %v555_v50, 0.0 }
 0x14d   : > { %v507_v51 = vpop.f32.mrf.mxu0 }
 0x14e   : > { %v508_v52 = vadd.f32 %v507_v51, %v1669_v11  ;;  %v556_v53 = vpop.f32.mrf.mxu1 }
 0x14f   : > { %v557_v54 = vadd.f32 %v556_v53, %v1671_v12 }
 0x150   : > { %v589_v56 = vmax.f32 %v508_v52, 0.0 }
 0x151   : > { %v590_v58 = vmax.f32 %v557_v54, 0.0 }
 0x152   : > { %v605_v59 = vpack.c.bf16 %v589_v56, %v587_v55 }
 0x153   : > { %v606_v60 = vpack.c.bf16 %v590_v58, %v588_v57 }
 0x154   : > { %782 = vmatmul.bf16.gmra.mxu2 %v605_v59 }
 0x155   : > { %831 = vmatmul.bf16.gmra.mxu3 %v606_v60 }
 0x167   : > { %v748_v62 = vpop.f32.mrf.mxu2 }
 0x168   : > { %v749_v63 = vadd.f32 %v1708_v61, %v748_v62  ;;  %v797_v11 = vpop.f32.mrf.mxu3 }
 0x16a   : > { %v798_v0 = vadd.f32 %v797_v11, %v749_v63 }
 0x16c   : > { %v837_v12 = vmax.f32 %v798_v0, 0.0 }
 0x16e   : > { %853 = vst [vmem:[%s1712_s16] sm:$0xff] %v837_v12 }
 0x16f   : > { %v750_v1 = vpop.f32.mrf.mxu2 }
 0x170   : > { %v751_v2 = vadd.f32 %v1708_v61, %v750_v1  ;;  %v799_v3 = vpop.f32.mrf.mxu3 }
 0x172   : > { %v800_v4 = vadd.f32 %v799_v3, %v751_v2 }
 0x174   : > { %v838_v5 = vmax.f32 %v800_v4, 0.0 }
 0x176   : > { %854 = vst [vmem:[%s1712_s16 + $0x8] sm:$0xff] %v838_v5 }
 0x177   : > { %v753_v6 = vpop.f32.mrf.mxu2 }
 0x178   : > { %v754_v7 = vadd.f32 %v1708_v61, %v753_v6  ;;  %v802_v8 = vpop.f32.mrf.mxu3 }
 0x17a   : > { %v803_v9 = vadd.f32 %v802_v8, %v754_v7 }
 0x17c   : > { %v839_v10 = vmax.f32 %v803_v9, 0.0 }
 0x17e   : > { %855 = vst [vmem:[%s1712_s16 + $0x10] sm:$0xff] %v839_v10 }
 0x17f   : > { %v755_v13 = vpop.f32.mrf.mxu2 }
 0x180   : > { %v756_v14 = vadd.f32 %v1708_v61, %v755_v13  ;;  %v804_v15 = vpop.f32.mrf.mxu3 }
 0x182   : > { %v805_v16 = vadd.f32 %v804_v15, %v756_v14 }
 0x184   : > { %v840_v17 = vmax.f32 %v805_v16, 0.0 }
 0x186   : > { %856 = vst [vmem:[%s1712_s16 + $0x18] sm:$0xff] %v840_v17 }
 0x187   : > { %v758_v18 = vpop.f32.mrf.mxu2 }
 0x188   : > { %v759_v19 = vadd.f32 %v1708_v61, %v758_v18  ;;  %v807_v20 = vpop.f32.mrf.mxu3 }
 0x18a   : > { %v808_v21 = vadd.f32 %v807_v20, %v759_v19 }
 0x18c   : > { %v841_v22 = vmax.f32 %v808_v21, 0.0 }
 0x18e   : > { %857 = vst [vmem:[%s1712_s16 + $0x20] sm:$0xff] %v841_v22 }
 0x18f   : > { %v760_v23 = vpop.f32.mrf.mxu2 }
 0x190   : > { %v761_v24 = vadd.f32 %v1708_v61, %v760_v23  ;;  %v809_v25 = vpop.f32.mrf.mxu3 }
 0x192   : > { %v810_v26 = vadd.f32 %v809_v25, %v761_v24 }
 0x194   : > { %v842_v27 = vmax.f32 %v810_v26, 0.0 }
 0x196   : > { %858 = vst [vmem:[%s1712_s16 + $0x28] sm:$0xff] %v842_v27 }
 0x197   : > { %v763_v28 = vpop.f32.mrf.mxu2 }
 0x198   : > { %v764_v29 = vadd.f32 %v1708_v61, %v763_v28  ;;  %v812_v30 = vpop.f32.mrf.mxu3 }
 0x19a   : > { %v813_v31 = vadd.f32 %v812_v30, %v764_v29 }
 0x19c   : > { %v843_v32 = vmax.f32 %v813_v31, 0.0 }
 0x19e   : > { %859 = vst [vmem:[%s1712_s16 + $0x30] sm:$0xff] %v843_v32 }
 0x19f   : > { %v765_v33 = vpop.f32.mrf.mxu2 }
 0x1a0   : > { %v766_v34 = vadd.f32 %v1708_v61, %v765_v33  ;;  %v814_v35 = vpop.f32.mrf.mxu3 }
 0x1a2   : > { %v815_v36 = vadd.f32 %v814_v35, %v766_v34 }
 0x1a4   : > { %v844_v37 = vmax.f32 %v815_v36, 0.0 }
 0x1a6   : > { %860 = vst [vmem:[%s1712_s16 + $0x38] sm:$0xff] %v844_v37 }
 0x1a7   : > { %v768_v38 = vpop.f32.mrf.mxu2 }
 0x1a8   : > { %v769_v39 = vadd.f32 %v1708_v61, %v768_v38  ;;  %v817_v40 = vpop.f32.mrf.mxu3 }
 0x1aa   : > { %v818_v41 = vadd.f32 %v817_v40, %v769_v39 }
 0x1ac   : > { %v845_v42 = vmax.f32 %v818_v41, 0.0 }
 0x1ae   : > { %861 = vst [vmem:[%s1712_s16 + $0x40] sm:$0xff] %v845_v42 }
 0x1af   : > { %v770_v43 = vpop.f32.mrf.mxu2 }
 0x1b0   : > { %v771_v44 = vadd.f32 %v1708_v61, %v770_v43  ;;  %v819_v45 = vpop.f32.mrf.mxu3 }
 0x1b2   : > { %v820_v46 = vadd.f32 %v819_v45, %v771_v44 }
 0x1b4   : > { %v846_v47 = vmax.f32 %v820_v46, 0.0 }
 0x1b6   : > { %862 = vst [vmem:[%s1712_s16 + $0x48] sm:$0xff] %v846_v47 }
 0x1b7   : > { %v773_v48 = vpop.f32.mrf.mxu2 }
 0x1b8   : > { %v774_v49 = vadd.f32 %v1708_v61, %v773_v48  ;;  %v822_v50 = vpop.f32.mrf.mxu3 }
 0x1ba   : > { %v823_v51 = vadd.f32 %v822_v50, %v774_v49 }
 0x1bc   : > { %v847_v52 = vmax.f32 %v823_v51, 0.0 }
 0x1be   : > { %863 = vst [vmem:[%s1712_s16 + $0x50] sm:$0xff] %v847_v52 }
 0x1bf   : > { %v775_v53 = vpop.f32.mrf.mxu2 }
 0x1c0   : > { %v776_v54 = vadd.f32 %v1708_v61, %v775_v53  ;;  %v824_v55 = vpop.f32.mrf.mxu3 }
 0x1c2   : > { %v825_v56 = vadd.f32 %v824_v55, %v776_v54 }
 0x1c4   : > { %v848_v57 = vmax.f32 %v825_v56, 0.0 }
 0x1c6   : > { %864 = vst [vmem:[%s1712_s16 + $0x58] sm:$0xff] %v848_v57 }
 0x1c7   : > { %v778_v58 = vpop.f32.mrf.mxu2 }
 0x1c8   : > { %v779_v59 = vadd.f32 %v1708_v61, %v778_v58  ;;  %v827_v60 = vpop.f32.mrf.mxu3 }
 0x1ca   : > { %v828_v62 = vadd.f32 %v827_v60, %v779_v59 }
 0x1cc   : > { %v849_v63 = vmax.f32 %v828_v62, 0.0 }
 0x1ce   : > { %865 = vst [vmem:[%s1712_s16 + $0x60] sm:$0xff] %v849_v63 }
 0x1cf   : > { %v780_v11 = vpop.f32.mrf.mxu2 }
 0x1d0   : > { %v781_v0 = vadd.f32 %v1708_v61, %v780_v11  ;;  %v829_v12 = vpop.f32.mrf.mxu3 }
 0x1d2   : > { %v830_v1 = vadd.f32 %v829_v12, %v781_v0 }
 0x1d4   : > { %v850_v2 = vmax.f32 %v830_v1, 0.0 }
 0x1d6   : > { %866 = vst [vmem:[%s1712_s16 + $0x68] sm:$0xff] %v850_v2 }
 0x1d7   : > { %v783_v3 = vpop.f32.mrf.mxu2 }
 0x1d8   : > { %v784_v4 = vadd.f32 %v1708_v61, %v783_v3  ;;  %v832_v5 = vpop.f32.mrf.mxu3 }
 0x1da   : > { %v833_v6 = vadd.f32 %v832_v5, %v784_v4 }
 0x1dc   : > { %v851_v7 = vmax.f32 %v833_v6, 0.0 }
 0x1de   : > { %867 = vst [vmem:[%s1712_s16 + $0x70] sm:$0xff] %v851_v7 }
 0x1df   : > { %v785_v8 = vpop.f32.mrf.mxu2 }
 0x1e0   : > { %v786_v9 = vadd.f32 %v1708_v61, %v785_v8  ;;  %v834_v10 = vpop.f32.mrf.mxu3 }
 0x1e2   : > { %v835_v13 = vadd.f32 %v834_v10, %v786_v9 }
 0x1e4   : > { %v852_v14 = vmax.f32 %v835_v13, 0.0 }
 0x1e6   : > { %868 = vst [vmem:[%s1712_s16 + $0x78] sm:$0xff] %v852_v14 }
 0x1e7   : > { %1440 = shalt.err (!%p1437_p10)
}
 0x1e8   : > { %s1496_s17 = smov 128   ;;  %s1497_s28 = smov 8  }
 0x1e9   : > { %1223 = dma.vmem_to_hbm [thread:$0]  (%p1613_p3), %s883_s12, 2048, %s885_s14, %s870_s15, %s1496_s17, %s1496_s17, %s1497_s28  }
 0x1ea PF: > { %s899_s16 = sand.u32 1, %s1475_s18   ;;  %p1793_p12 = scmp.ge.s32.totalorder %s1487_s21, 2 }
 0x1eb   : > { %s900_s23 = scalar_lea.sflag [#allocation4], %s899_s16 }
 0x1ec   : > { %p1240_p13 = pnand %p1793_p12, %p1563_p6 }
 0x1ee   : > { %p1241_p0 = pneg %p1240_p13 }
 0x1f0   : > { %1470 = dma.done.wait (%p1241_p0), %s900_s23, 2048  }
 0x1f1   : > { %1472 = vsyncadd (%p1241_p0), %s900_s23, 4294965248  ;;  %p20_p5 = scmp.ge.s32.totalorder %s1600_s30, 4   ;;  %s1794_s18 = smov %s1479_s19 }
 0x1f2   : > { %s1795_s19 = smov %s1483_s20  ;;  %s1796_s20 = smov %s1609_s9 }
 0x1f3   : > { %s1797_s21 = smov %s1600_s30  ;;  %22 = sbr.rel (!%p20_p5) target bundleno = 7 (0x7), region = 97 }
 0x1f8   :  { %906 = vsyncpa [#allocation3], 1 }
 0x1f9   :  { %908 = vsyncpa [#allocation3 + $0x1], 1 }
 0x1fa   :  { %909 = vsyncpa [#allocation6], 1 }
 0x1fb   :  { %910 = vsyncpa [#allocation9], 1 }
 0x1fc   :  { %911 = vsyncpa [#allocation4], 1 }
 0x1fd   :  { %913 = vsyncpa [#allocation4 + $0x1], 1 }

</bundles_post_ra>
